<compile_context>
chip_gen: v7x
topology: tpu7x:2x2x1
jax: 0.10.0
libtpu: 0.0.40
codegen_flags: <defaults>
</compile_context>

<pallas_src>
import jax
import jax.numpy as jnp
from jax.experimental import pallas as pl
from jax.experimental.pallas import tpu as pltpu

img_size = 32
LRELU_SLOPE = 0.2
BN_EPS = 0.8                      # BatchNorm2d(out_filters, 0.8) -> eps = 0.8

# (C_in, C_out, has_batchnorm)
CONV_LAYERS = [(1, 16, False), (16, 32, True), (32, 64, True), (64, 128, True)]
DS = img_size // (2 ** 4)         # 2
FEAT = 128 * DS * DS              # 512
HEAD_PAD = 128                    # lane-pad the 1-wide head output to a full lane width


# ----------------------------- Pallas kernels ------------------------------

def conv_gemm_kernel(p_ref, w_ref, b_ref, s_ref, t_ref, o_ref):
    """im2col GEMM + bias + LeakyReLU + folded BatchNorm for one conv block.

    p_ref: (TM, 9*C_in)  bf16 patches        w_ref: (9*C_in, C_out) bf16
    b_ref, s_ref, t_ref: (1, C_out) f32 bias / BN-scale / BN-shift
    o_ref: (TM, C_out) f32
    """
    acc = jnp.dot(p_ref[...], w_ref[...], preferred_element_type=jnp.float32)
    h = acc + b_ref[...]
    h = jnp.where(h > 0, h, LRELU_SLOPE * h)          # LeakyReLU(0.2)
    # Dropout2d(0.25): identity in inference.
    o_ref[...] = h * s_ref[...] + t_ref[...]          # BatchNorm folded to scale/shift


def head_kernel(x_ref, w_ref, b_ref, o_ref):
    """Linear(512 -> lane-padded 128, real width 1) + Sigmoid."""
    logits = jnp.dot(x_ref[...], w_ref[...], preferred_element_type=jnp.float32) + b_ref[...]
    # Sigmoid with the reciprocal on the EUP slot (exp is already EUP).
    o_ref[...] = pl.reciprocal(1.0 + jnp.exp(-logits), approx=True)


# ------------------------------ Pallas wrappers -----------------------------

def _pick_tile(m):
    for t in (256, 128, 64, 32, 16, 8):
        if m % t == 0:
            return t
    return m  # fall back to a single full-extent block


def conv_gemm(patches, w, b, scale, shift):
    m, k = patches.shape
    n = w.shape[1]
    tm = _pick_tile(m)
    grid = (m // tm,)
    return pl.pallas_call(
        conv_gemm_kernel,
        out_shape=jax.ShapeDtypeStruct((m, n), jnp.float32),
        grid=grid,
        in_specs=[
            pl.BlockSpec((tm, k), lambda i: (i, 0)),   # patches: tiled over M
            pl.BlockSpec((k, n), lambda i: (0, 0)),    # weights: resident across M grid
            pl.BlockSpec((1, n), lambda i: (0, 0)),    # bias
            pl.BlockSpec((1, n), lambda i: (0, 0)),    # BN scale
            pl.BlockSpec((1, n), lambda i: (0, 0)),    # BN shift
        ],
        out_specs=pl.BlockSpec((tm, n), lambda i: (i, 0)),
        compiler_params=pltpu.CompilerParams(dimension_semantics=("parallel",)),
    )(patches.astype(jnp.bfloat16), w.astype(jnp.bfloat16), b, scale, shift)


def head_call(feat, w_pad, b_pad):
    bsz = feat.shape[0]
    n = w_pad.shape[1]
    vmem = pl.BlockSpec(memory_space=pltpu.MemorySpace.VMEM)
    return pl.pallas_call(
        head_kernel,
        out_shape=jax.ShapeDtypeStruct((bsz, n), jnp.float32),
        in_specs=[vmem, vmem, vmem],
        out_specs=vmem,
    )(feat.astype(jnp.bfloat16), w_pad.astype(jnp.bfloat16), b_pad)


# --------------------------- JAX glue (data movement only) ------------------

def extract_patches(x):
    """x: (B, H, W, C) NHWC -> (B*Ho*Wo, 9*C) im2col patches for 3x3/stride-2/pad-1."""
    bsz, h, w, c = x.shape
    ho, wo = h // 2, w // 2
    xp = jnp.pad(x, ((0, 0), (1, 1), (1, 1), (0, 0)))
    taps = []
    for dh in range(3):
        for dw in range(3):
            taps.append(xp[:, dh:dh + 2 * ho:2, dw:dw + 2 * wo:2, :])
    patches = jnp.concatenate(taps, axis=-1)                 # (B, Ho, Wo, 9C)
    return patches.reshape(bsz * ho * wo, 9 * c), (bsz, ho, wo)


def init_params(key):
    """PyTorch-style init.  Conv weights stored as (9*C_in, C_out) in im2col
    layout [(dh,dw) major, ci minor]; head weight as (512, 1).  Checkpoint
    import would need the corresponding transpose/reorder."""
    params = {"conv": [], "head": None}
    for (cin, cout, bn) in CONV_LAYERS:
        key, kw, kb = jax.random.split(key, 3)
        fan_in = cin * 9
        bound = 1.0 / (fan_in ** 0.5)
        w = jax.random.uniform(kw, (9 * cin, cout), jnp.float32, -bound, bound)
        b = jax.random.uniform(kb, (1, cout), jnp.float32, -bound, bound)
        if bn:
            gamma = jnp.ones((1, cout), jnp.float32)
            beta = jnp.zeros((1, cout), jnp.float32)
            mean = jnp.zeros((1, cout), jnp.float32)
            var = jnp.ones((1, cout), jnp.float32)
            bn_p = (gamma, beta, mean, var)
        else:
            bn_p = None
        params["conv"].append({"w": w, "b": b, "bn": bn_p})
    key, kw, kb = jax.random.split(key, 3)
    bound = 1.0 / (FEAT ** 0.5)
    wf = jax.random.uniform(kw, (FEAT, 1), jnp.float32, -bound, bound)
    bf = jax.random.uniform(kb, (1, 1), jnp.float32, -bound, bound)
    params["head"] = (wf, bf)
    return params


@jax.jit
def discriminator_forward(img, params):
    """img: (B, 1, 32, 32) NCHW (like the PyTorch module) -> validity (B, 1)."""
    bsz = img.shape[0]
    x = jnp.transpose(img, (0, 2, 3, 1))                     # NHWC
    for layer in params["conv"]:
        patches, (_, ho, wo) = extract_patches(x)
        cout = layer["w"].shape[1]
        if layer["bn"] is not None:
            gamma, beta, mean, var = layer["bn"]
            scale = gamma * jax.lax.rsqrt(var + BN_EPS)      # eps = 0.8 (module quirk)
            shift = beta - mean * scale
        else:
            scale = jnp.ones((1, cout), jnp.float32)
            shift = jnp.zeros((1, cout), jnp.float32)
        y = conv_gemm(patches, layer["w"], layer["b"], scale, shift)
        x = y.reshape(bsz, ho, wo, cout)

    # Flatten exactly like PyTorch's out.view(B, -1) on NCHW.
    feat = jnp.transpose(x, (0, 3, 1, 2)).reshape(bsz, FEAT)  # (B, 512)

    wf, bf = params["head"]
    wf_pad = jnp.pad(wf, ((0, 0), (0, HEAD_PAD - wf.shape[1])))
    bf_pad = jnp.pad(bf, ((0, 0), (0, HEAD_PAD - bf.shape[1])))
    validity_pad = head_call(feat, wf_pad, bf_pad)            # (B, 128)
    return validity_pad[:, :1]                                # (B, 1)


if __name__ == "__main__":
    key = jax.random.PRNGKey(0)
    kimg, kp = jax.random.split(key)

    batch = 2
    img = jax.random.normal(kimg, (batch, 1, img_size, img_size), jnp.float32)
    params = init_params(kp)

    validity = discriminator_forward(img, params)
    jax.block_until_ready(validity)

    assert validity.shape == (batch, 1)
    assert bool(jnp.all(jnp.isfinite(validity)))
    # sigmoid range (inclusive bounds: approx reciprocal / overflow can saturate)
    assert bool(jnp.all(validity >= 0.0)) and bool(jnp.all(validity <= 1.0))

    print("KERNEL_OK")
</pallas_src>

<mosaic_0001>
module attributes {stable_mosaic.version = 11 : i64} {
  func.func @conv_gemm_kernel(%arg0: i32, %arg1: memref<256x9xbf16, #tpu.memory_space<vmem>>, %arg2: memref<9x16xbf16, #tpu.memory_space<vmem>>, %arg3: memref<1x16xf32, #tpu.memory_space<vmem>>, %arg4: memref<1x16xf32, #tpu.memory_space<vmem>>, %arg5: memref<1x16xf32, #tpu.memory_space<vmem>>, %arg6: memref<256x16xf32, #tpu.memory_space<vmem>>) attributes {dimension_semantics = [#tpu.dimension_semantics<parallel>], iteration_bounds = array<i64: 2>, scalar_prefetch = 0 : i64, scratch_operands = 0 : i64, tpu.core_type = #tpu.core_type<tc>, window_params = [{transform_indices = @transform_0, window_bounds = array<i64: 256, 9>}, {pipeline_mode = #tpu.pipeline_mode<synchronous>, transform_indices = @transform_1, window_bounds = array<i64: 9, 16>}, {pipeline_mode = #tpu.pipeline_mode<synchronous>, transform_indices = @transform_2, window_bounds = array<i64: 1, 16>}, {pipeline_mode = #tpu.pipeline_mode<synchronous>, transform_indices = @transform_3, window_bounds = array<i64: 1, 16>}, {pipeline_mode = #tpu.pipeline_mode<synchronous>, transform_indices = @transform_4, window_bounds = array<i64: 1, 16>}, {transform_indices = @transform_5, window_bounds = array<i64: 256, 16>}]} {
    %c0 = arith.constant 0 : index
    %c0_0 = arith.constant 0 : index
    %0 = vector.load %arg1[%c0, %c0_0] : memref<256x9xbf16, #tpu.memory_space<vmem>>, vector<256x9xbf16>
    %c0_1 = arith.constant 0 : index
    %c0_2 = arith.constant 0 : index
    %1 = vector.load %arg2[%c0_1, %c0_2] : memref<9x16xbf16, #tpu.memory_space<vmem>>, vector<9x16xbf16>
    %cst = arith.constant dense<0.000000e+00> : vector<256x16xf32>
    %2 = tpu.matmul %0, %1, %cst {dimension_numbers = #tpu.dot_dimension_numbers<[1], [0], [0], [1], [0, 0, 1, 1], [], []>} : vector<256x9xbf16>, vector<9x16xbf16>, vector<256x16xf32> -> vector<256x16xf32>
    %c0_3 = arith.constant 0 : index
    %c0_4 = arith.constant 0 : index
    %3 = vector.load %arg3[%c0_3, %c0_4] : memref<1x16xf32, #tpu.memory_space<vmem>>, vector<1x16xf32>
    %4 = vector.broadcast %3 : vector<1x16xf32> to vector<256x16xf32>
    %5 = arith.addf %2, %4 : vector<256x16xf32>
    %cst_5 = arith.constant 0.000000e+00 : f32
    %6 = vector.broadcast %cst_5 : f32 to vector<256x16xf32>
    %7 = arith.cmpf ogt, %5, %6 : vector<256x16xf32>
    %cst_6 = arith.constant 2.000000e-01 : f32
    %8 = vector.broadcast %cst_6 : f32 to vector<256x16xf32>
    %9 = arith.mulf %8, %5 : vector<256x16xf32>
    %10 = arith.select %7, %5, %9 : vector<256x16xi1>, vector<256x16xf32>
    %c0_7 = arith.constant 0 : index
    %c0_8 = arith.constant 0 : index
    %11 = vector.load %arg4[%c0_7, %c0_8] : memref<1x16xf32, #tpu.memory_space<vmem>>, vector<1x16xf32>
    %12 = vector.broadcast %11 : vector<1x16xf32> to vector<256x16xf32>
    %13 = arith.mulf %10, %12 : vector<256x16xf32>
    %c0_9 = arith.constant 0 : index
    %c0_10 = arith.constant 0 : index
    %14 = vector.load %arg5[%c0_9, %c0_10] : memref<1x16xf32, #tpu.memory_space<vmem>>, vector<1x16xf32>
    %15 = vector.broadcast %14 : vector<1x16xf32> to vector<256x16xf32>
    %16 = arith.addf %13, %15 : vector<256x16xf32>
    %c0_11 = arith.constant 0 : index
    %c0_12 = arith.constant 0 : index
    %17 = vector.load %arg6[%c0_11, %c0_12] : memref<256x16xf32, #tpu.memory_space<vmem>>, vector<256x16xf32>
    tpu.vector_store %arg6[%c0_11, %c0_12], %16 {strides = array<i32>} : memref<256x16xf32, #tpu.memory_space<vmem>>, vector<256x16xf32>,
    return
  }
  func.func @transform_0(%arg0: i32) -> (i32, i32) {
    %c0_i32 = arith.constant 0 : i32
    %c0_i32_0 = arith.constant 0 : i32
    return %arg0, %c0_i32 : i32, i32
  }
  func.func @transform_1(%arg0: i32) -> (i32, i32) {
    %c0_i32 = arith.constant 0 : i32
    %c0_i32_0 = arith.constant 0 : i32
    %c0_i32_1 = arith.constant 0 : i32
    return %c0_i32, %c0_i32_0 : i32, i32
  }
  func.func @transform_2(%arg0: i32) -> (i32, i32) {
    %c0_i32 = arith.constant 0 : i32
    %c0_i32_0 = arith.constant 0 : i32
    %c0_i32_1 = arith.constant 0 : i32
    return %c0_i32, %c0_i32_0 : i32, i32
  }
  func.func @transform_3(%arg0: i32) -> (i32, i32) {
    %c0_i32 = arith.constant 0 : i32
    %c0_i32_0 = arith.constant 0 : i32
    %c0_i32_1 = arith.constant 0 : i32
    return %c0_i32, %c0_i32_0 : i32, i32
  }
  func.func @transform_4(%arg0: i32) -> (i32, i32) {
    %c0_i32 = arith.constant 0 : i32
    %c0_i32_0 = arith.constant 0 : i32
    %c0_i32_1 = arith.constant 0 : i32
    return %c0_i32, %c0_i32_0 : i32, i32
  }
  func.func @transform_5(%arg0: i32) -> (i32, i32) {
    %c0_i32 = arith.constant 0 : i32
    %c0_i32_0 = arith.constant 0 : i32
    return %arg0, %c0_i32 : i32, i32
  }
}

module attributes {stable_mosaic.version = 11 : i64} {
  func.func @conv_gemm_kernel(%arg0: i32, %arg1: memref<128x144xbf16, #tpu.memory_space<vmem>>, %arg2: memref<144x32xbf16, #tpu.memory_space<vmem>>, %arg3: memref<1x32xf32, #tpu.memory_space<vmem>>, %arg4: memref<1x32xf32, #tpu.memory_space<vmem>>, %arg5: memref<1x32xf32, #tpu.memory_space<vmem>>, %arg6: memref<128x32xf32, #tpu.memory_space<vmem>>) attributes {dimension_semantics = [#tpu.dimension_semantics<parallel>], iteration_bounds = array<i64: 1>, scalar_prefetch = 0 : i64, scratch_operands = 0 : i64, tpu.core_type = #tpu.core_type<tc>, window_params = [{transform_indices = @transform_0, window_bounds = array<i64: 128, 144>}, {pipeline_mode = #tpu.pipeline_mode<synchronous>, transform_indices = @transform_1, window_bounds = array<i64: 144, 32>}, {pipeline_mode = #tpu.pipeline_mode<synchronous>, transform_indices = @transform_2, window_bounds = array<i64: 1, 32>}, {pipeline_mode = #tpu.pipeline_mode<synchronous>, transform_indices = @transform_3, window_bounds = array<i64: 1, 32>}, {pipeline_mode = #tpu.pipeline_mode<synchronous>, transform_indices = @transform_4, window_bounds = array<i64: 1, 32>}, {transform_indices = @transform_5, window_bounds = array<i64: 128, 32>}]} {
    %c0 = arith.constant 0 : index
    %c0_0 = arith.constant 0 : index
    %0 = vector.load %arg1[%c0, %c0_0] : memref<128x144xbf16, #tpu.memory_space<vmem>>, vector<128x144xbf16>
    %c0_1 = arith.constant 0 : index
    %c0_2 = arith.constant 0 : index
    %1 = vector.load %arg2[%c0_1, %c0_2] : memref<144x32xbf16, #tpu.memory_space<vmem>>, vector<144x32xbf16>
    %cst = arith.constant dense<0.000000e+00> : vector<128x32xf32>
    %2 = tpu.matmul %0, %1, %cst {dimension_numbers = #tpu.dot_dimension_numbers<[1], [0], [0], [1], [0, 0, 1, 1], [], []>} : vector<128x144xbf16>, vector<144x32xbf16>, vector<128x32xf32> -> vector<128x32xf32>
    %c0_3 = arith.constant 0 : index
    %c0_4 = arith.constant 0 : index
    %3 = vector.load %arg3[%c0_3, %c0_4] : memref<1x32xf32, #tpu.memory_space<vmem>>, vector<1x32xf32>
    %4 = vector.broadcast %3 : vector<1x32xf32> to vector<128x32xf32>
    %5 = arith.addf %2, %4 : vector<128x32xf32>
    %cst_5 = arith.constant 0.000000e+00 : f32
    %6 = vector.broadcast %cst_5 : f32 to vector<128x32xf32>
    %7 = arith.cmpf ogt, %5, %6 : vector<128x32xf32>
    %cst_6 = arith.constant 2.000000e-01 : f32
    %8 = vector.broadcast %cst_6 : f32 to vector<128x32xf32>
    %9 = arith.mulf %8, %5 : vector<128x32xf32>
    %10 = arith.select %7, %5, %9 : vector<128x32xi1>, vector<128x32xf32>
    %c0_7 = arith.constant 0 : index
    %c0_8 = arith.constant 0 : index
    %11 = vector.load %arg4[%c0_7, %c0_8] : memref<1x32xf32, #tpu.memory_space<vmem>>, vector<1x32xf32>
    %12 = vector.broadcast %11 : vector<1x32xf32> to vector<128x32xf32>
    %13 = arith.mulf %10, %12 : vector<128x32xf32>
    %c0_9 = arith.constant 0 : index
    %c0_10 = arith.constant 0 : index
    %14 = vector.load %arg5[%c0_9, %c0_10] : memref<1x32xf32, #tpu.memory_space<vmem>>, vector<1x32xf32>
    %15 = vector.broadcast %14 : vector<1x32xf32> to vector<128x32xf32>
    %16 = arith.addf %13, %15 : vector<128x32xf32>
    %c0_11 = arith.constant 0 : index
    %c0_12 = arith.constant 0 : index
    %17 = vector.load %arg6[%c0_11, %c0_12] : memref<128x32xf32, #tpu.memory_space<vmem>>, vector<128x32xf32>
    tpu.vector_store %arg6[%c0_11, %c0_12], %16 {strides = array<i32>} : memref<128x32xf32, #tpu.memory_space<vmem>>, vector<128x32xf32>,
    return
  }
  func.func @transform_0(%arg0: i32) -> (i32, i32) {
    %c0_i32 = arith.constant 0 : i32
    %c0_i32_0 = arith.constant 0 : i32
    return %arg0, %c0_i32 : i32, i32
  }
  func.func @transform_1(%arg0: i32) -> (i32, i32) {
    %c0_i32 = arith.constant 0 : i32
    %c0_i32_0 = arith.constant 0 : i32
    %c0_i32_1 = arith.constant 0 : i32
    return %c0_i32, %c0_i32_0 : i32, i32
  }
  func.func @transform_2(%arg0: i32) -> (i32, i32) {
    %c0_i32 = arith.constant 0 : i32
    %c0_i32_0 = arith.constant 0 : i32
    %c0_i32_1 = arith.constant 0 : i32
    return %c0_i32, %c0_i32_0 : i32, i32
  }
  func.func @transform_3(%arg0: i32) -> (i32, i32) {
    %c0_i32 = arith.constant 0 : i32
    %c0_i32_0 = arith.constant 0 : i32
    %c0_i32_1 = arith.constant 0 : i32
    return %c0_i32, %c0_i32_0 : i32, i32
  }
  func.func @transform_4(%arg0: i32) -> (i32, i32) {
    %c0_i32 = arith.constant 0 : i32
    %c0_i32_0 = arith.constant 0 : i32
    %c0_i32_1 = arith.constant 0 : i32
    return %c0_i32, %c0_i32_0 : i32, i32
  }
  func.func @transform_5(%arg0: i32) -> (i32, i32) {
    %c0_i32 = arith.constant 0 : i32
    %c0_i32_0 = arith.constant 0 : i32
    return %arg0, %c0_i32 : i32, i32
  }
}

module attributes {stable_mosaic.version = 11 : i64} {
  func.func @conv_gemm_kernel(%arg0: i32, %arg1: memref<32x288xbf16, #tpu.memory_space<vmem>>, %arg2: memref<288x64xbf16, #tpu.memory_space<vmem>>, %arg3: memref<1x64xf32, #tpu.memory_space<vmem>>, %arg4: memref<1x64xf32, #tpu.memory_space<vmem>>, %arg5: memref<1x64xf32, #tpu.memory_space<vmem>>, %arg6: memref<32x64xf32, #tpu.memory_space<vmem>>) attributes {dimension_semantics = [#tpu.dimension_semantics<parallel>], iteration_bounds = array<i64: 1>, scalar_prefetch = 0 : i64, scratch_operands = 0 : i64, tpu.core_type = #tpu.core_type<tc>, window_params = [{transform_indices = @transform_0, window_bounds = array<i64: 32, 288>}, {pipeline_mode = #tpu.pipeline_mode<synchronous>, transform_indices = @transform_1, window_bounds = array<i64: 288, 64>}, {pipeline_mode = #tpu.pipeline_mode<synchronous>, transform_indices = @transform_2, window_bounds = array<i64: 1, 64>}, {pipeline_mode = #tpu.pipeline_mode<synchronous>, transform_indices = @transform_3, window_bounds = array<i64: 1, 64>}, {pipeline_mode = #tpu.pipeline_mode<synchronous>, transform_indices = @transform_4, window_bounds = array<i64: 1, 64>}, {transform_indices = @transform_5, window_bounds = array<i64: 32, 64>}]} {
    %c0 = arith.constant 0 : index
    %c0_0 = arith.constant 0 : index
    %0 = vector.load %arg1[%c0, %c0_0] : memref<32x288xbf16, #tpu.memory_space<vmem>>, vector<32x288xbf16>
    %c0_1 = arith.constant 0 : index
    %c0_2 = arith.constant 0 : index
    %1 = vector.load %arg2[%c0_1, %c0_2] : memref<288x64xbf16, #tpu.memory_space<vmem>>, vector<288x64xbf16>
    %cst = arith.constant dense<0.000000e+00> : vector<32x64xf32>
    %2 = tpu.matmul %0, %1, %cst {dimension_numbers = #tpu.dot_dimension_numbers<[1], [0], [0], [1], [0, 0, 1, 1], [], []>} : vector<32x288xbf16>, vector<288x64xbf16>, vector<32x64xf32> -> vector<32x64xf32>
    %c0_3 = arith.constant 0 : index
    %c0_4 = arith.constant 0 : index
    %3 = vector.load %arg3[%c0_3, %c0_4] : memref<1x64xf32, #tpu.memory_space<vmem>>, vector<1x64xf32>
    %4 = vector.broadcast %3 : vector<1x64xf32> to vector<32x64xf32>
    %5 = arith.addf %2, %4 : vector<32x64xf32>
    %cst_5 = arith.constant 0.000000e+00 : f32
    %6 = vector.broadcast %cst_5 : f32 to vector<32x64xf32>
    %7 = arith.cmpf ogt, %5, %6 : vector<32x64xf32>
    %cst_6 = arith.constant 2.000000e-01 : f32
    %8 = vector.broadcast %cst_6 : f32 to vector<32x64xf32>
    %9 = arith.mulf %8, %5 : vector<32x64xf32>
    %10 = arith.select %7, %5, %9 : vector<32x64xi1>, vector<32x64xf32>
    %c0_7 = arith.constant 0 : index
    %c0_8 = arith.constant 0 : index
    %11 = vector.load %arg4[%c0_7, %c0_8] : memref<1x64xf32, #tpu.memory_space<vmem>>, vector<1x64xf32>
    %12 = vector.broadcast %11 : vector<1x64xf32> to vector<32x64xf32>
    %13 = arith.mulf %10, %12 : vector<32x64xf32>
    %c0_9 = arith.constant 0 : index
    %c0_10 = arith.constant 0 : index
    %14 = vector.load %arg5[%c0_9, %c0_10] : memref<1x64xf32, #tpu.memory_space<vmem>>, vector<1x64xf32>
    %15 = vector.broadcast %14 : vector<1x64xf32> to vector<32x64xf32>
    %16 = arith.addf %13, %15 : vector<32x64xf32>
    %c0_11 = arith.constant 0 : index
    %c0_12 = arith.constant 0 : index
    %17 = vector.load %arg6[%c0_11, %c0_12] : memref<32x64xf32, #tpu.memory_space<vmem>>, vector<32x64xf32>
    tpu.vector_store %arg6[%c0_11, %c0_12], %16 {strides = array<i32>} : memref<32x64xf32, #tpu.memory_space<vmem>>, vector<32x64xf32>,
    return
  }
  func.func @transform_0(%arg0: i32) -> (i32, i32) {
    %c0_i32 = arith.constant 0 : i32
    %c0_i32_0 = arith.constant 0 : i32
    return %arg0, %c0_i32 : i32, i32
  }
  func.func @transform_1(%arg0: i32) -> (i32, i32) {
    %c0_i32 = arith.constant 0 : i32
    %c0_i32_0 = arith.constant 0 : i32
    %c0_i32_1 = arith.constant 0 : i32
    return %c0_i32, %c0_i32_0 : i32, i32
  }
  func.func @transform_2(%arg0: i32) -> (i32, i32) {
    %c0_i32 = arith.constant 0 : i32
    %c0_i32_0 = arith.constant 0 : i32
    %c0_i32_1 = arith.constant 0 : i32
    return %c0_i32, %c0_i32_0 : i32, i32
  }
  func.func @transform_3(%arg0: i32) -> (i32, i32) {
    %c0_i32 = arith.constant 0 : i32
    %c0_i32_0 = arith.constant 0 : i32
    %c0_i32_1 = arith.constant 0 : i32
    return %c0_i32, %c0_i32_0 : i32, i32
  }
  func.func @transform_4(%arg0: i32) -> (i32, i32) {
    %c0_i32 = arith.constant 0 : i32
    %c0_i32_0 = arith.constant 0 : i32
    %c0_i32_1 = arith.constant 0 : i32
    return %c0_i32, %c0_i32_0 : i32, i32
  }
  func.func @transform_5(%arg0: i32) -> (i32, i32) {
    %c0_i32 = arith.constant 0 : i32
    %c0_i32_0 = arith.constant 0 : i32
    return %arg0, %c0_i32 : i32, i32
  }
}

module attributes {stable_mosaic.version = 11 : i64} {
  func.func @conv_gemm_kernel(%arg0: i32, %arg1: memref<8x576xbf16, #tpu.memory_space<vmem>>, %arg2: memref<576x128xbf16, #tpu.memory_space<vmem>>, %arg3: memref<1x128xf32, #tpu.memory_space<vmem>>, %arg4: memref<1x128xf32, #tpu.memory_space<vmem>>, %arg5: memref<1x128xf32, #tpu.memory_space<vmem>>, %arg6: memref<8x128xf32, #tpu.memory_space<vmem>>) attributes {dimension_semantics = [#tpu.dimension_semantics<parallel>], iteration_bounds = array<i64: 1>, scalar_prefetch = 0 : i64, scratch_operands = 0 : i64, tpu.core_type = #tpu.core_type<tc>, window_params = [{transform_indices = @transform_0, window_bounds = array<i64: 8, 576>}, {pipeline_mode = #tpu.pipeline_mode<synchronous>, transform_indices = @transform_1, window_bounds = array<i64: 576, 128>}, {pipeline_mode = #tpu.pipeline_mode<synchronous>, transform_indices = @transform_2, window_bounds = array<i64: 1, 128>}, {pipeline_mode = #tpu.pipeline_mode<synchronous>, transform_indices = @transform_3, window_bounds = array<i64: 1, 128>}, {pipeline_mode = #tpu.pipeline_mode<synchronous>, transform_indices = @transform_4, window_bounds = array<i64: 1, 128>}, {transform_indices = @transform_5, window_bounds = array<i64: 8, 128>}]} {
    %c0 = arith.constant 0 : index
    %c0_0 = arith.constant 0 : index
    %0 = vector.load %arg1[%c0, %c0_0] : memref<8x576xbf16, #tpu.memory_space<vmem>>, vector<8x576xbf16>
    %c0_1 = arith.constant 0 : index
    %c0_2 = arith.constant 0 : index
    %1 = vector.load %arg2[%c0_1, %c0_2] : memref<576x128xbf16, #tpu.memory_space<vmem>>, vector<576x128xbf16>
    %cst = arith.constant dense<0.000000e+00> : vector<8x128xf32>
    %2 = tpu.matmul %0, %1, %cst {dimension_numbers = #tpu.dot_dimension_numbers<[1], [0], [0], [1], [0, 0, 1, 1], [], []>} : vector<8x576xbf16>, vector<576x128xbf16>, vector<8x128xf32> -> vector<8x128xf32>
    %c0_3 = arith.constant 0 : index
    %c0_4 = arith.constant 0 : index
    %3 = vector.load %arg3[%c0_3, %c0_4] : memref<1x128xf32, #tpu.memory_space<vmem>>, vector<1x128xf32>
    %4 = vector.broadcast %3 : vector<1x128xf32> to vector<8x128xf32>
    %5 = arith.addf %2, %4 : vector<8x128xf32>
    %cst_5 = arith.constant 0.000000e+00 : f32
    %6 = vector.broadcast %cst_5 : f32 to vector<8x128xf32>
    %7 = arith.cmpf ogt, %5, %6 : vector<8x128xf32>
    %cst_6 = arith.constant 2.000000e-01 : f32
    %8 = vector.broadcast %cst_6 : f32 to vector<8x128xf32>
    %9 = arith.mulf %8, %5 : vector<8x128xf32>
    %10 = arith.select %7, %5, %9 : vector<8x128xi1>, vector<8x128xf32>
    %c0_7 = arith.constant 0 : index
    %c0_8 = arith.constant 0 : index
    %11 = vector.load %arg4[%c0_7, %c0_8] : memref<1x128xf32, #tpu.memory_space<vmem>>, vector<1x128xf32>
    %12 = vector.broadcast %11 : vector<1x128xf32> to vector<8x128xf32>
    %13 = arith.mulf %10, %12 : vector<8x128xf32>
    %c0_9 = arith.constant 0 : index
    %c0_10 = arith.constant 0 : index
    %14 = vector.load %arg5[%c0_9, %c0_10] : memref<1x128xf32, #tpu.memory_space<vmem>>, vector<1x128xf32>
    %15 = vector.broadcast %14 : vector<1x128xf32> to vector<8x128xf32>
    %16 = arith.addf %13, %15 : vector<8x128xf32>
    %c0_11 = arith.constant 0 : index
    %c0_12 = arith.constant 0 : index
    %17 = vector.load %arg6[%c0_11, %c0_12] : memref<8x128xf32, #tpu.memory_space<vmem>>, vector<8x128xf32>
    tpu.vector_store %arg6[%c0_11, %c0_12], %16 {strides = array<i32>} : memref<8x128xf32, #tpu.memory_space<vmem>>, vector<8x128xf32>,
    return
  }
  func.func @transform_0(%arg0: i32) -> (i32, i32) {
    %c0_i32 = arith.constant 0 : i32
    %c0_i32_0 = arith.constant 0 : i32
    return %arg0, %c0_i32 : i32, i32
  }
  func.func @transform_1(%arg0: i32) -> (i32, i32) {
    %c0_i32 = arith.constant 0 : i32
    %c0_i32_0 = arith.constant 0 : i32
    %c0_i32_1 = arith.constant 0 : i32
    return %c0_i32, %c0_i32_0 : i32, i32
  }
  func.func @transform_2(%arg0: i32) -> (i32, i32) {
    %c0_i32 = arith.constant 0 : i32
    %c0_i32_0 = arith.constant 0 : i32
    %c0_i32_1 = arith.constant 0 : i32
    return %c0_i32, %c0_i32_0 : i32, i32
  }
  func.func @transform_3(%arg0: i32) -> (i32, i32) {
    %c0_i32 = arith.constant 0 : i32
    %c0_i32_0 = arith.constant 0 : i32
    %c0_i32_1 = arith.constant 0 : i32
    return %c0_i32, %c0_i32_0 : i32, i32
  }
  func.func @transform_4(%arg0: i32) -> (i32, i32) {
    %c0_i32 = arith.constant 0 : i32
    %c0_i32_0 = arith.constant 0 : i32
    %c0_i32_1 = arith.constant 0 : i32
    return %c0_i32, %c0_i32_0 : i32, i32
  }
  func.func @transform_5(%arg0: i32) -> (i32, i32) {
    %c0_i32 = arith.constant 0 : i32
    %c0_i32_0 = arith.constant 0 : i32
    return %arg0, %c0_i32 : i32, i32
  }
}

module attributes {stable_mosaic.version = 11 : i64} {
  func.func @head_kernel(%arg0: memref<2x512xbf16, #tpu.memory_space<vmem>>, %arg1: memref<512x128xbf16, #tpu.memory_space<vmem>>, %arg2: memref<1x128xf32, #tpu.memory_space<vmem>>, %arg3: memref<2x128xf32, #tpu.memory_space<vmem>>) attributes {dimension_semantics = [], scalar_prefetch = 0 : i64, scratch_operands = 0 : i64, tpu.core_type = #tpu.core_type<tc>} {
    %c0 = arith.constant 0 : index
    %c0_0 = arith.constant 0 : index
    %0 = vector.load %arg0[%c0, %c0_0] : memref<2x512xbf16, #tpu.memory_space<vmem>>, vector<2x512xbf16>
    %c0_1 = arith.constant 0 : index
    %c0_2 = arith.constant 0 : index
    %1 = vector.load %arg1[%c0_1, %c0_2] : memref<512x128xbf16, #tpu.memory_space<vmem>>, vector<512x128xbf16>
    %cst = arith.constant dense<0.000000e+00> : vector<2x128xf32>
    %2 = tpu.matmul %0, %1, %cst {dimension_numbers = #tpu.dot_dimension_numbers<[1], [0], [0], [1], [0, 0, 1, 1], [], []>} : vector<2x512xbf16>, vector<512x128xbf16>, vector<2x128xf32> -> vector<2x128xf32>
    %c0_3 = arith.constant 0 : index
    %c0_4 = arith.constant 0 : index
    %3 = vector.load %arg2[%c0_3, %c0_4] : memref<1x128xf32, #tpu.memory_space<vmem>>, vector<1x128xf32>
    %4 = vector.broadcast %3 : vector<1x128xf32> to vector<2x128xf32>
    %5 = arith.addf %2, %4 : vector<2x128xf32>
    %cst_5 = arith.constant 0.000000e+00 : f32
    %6 = vector.broadcast %cst_5 : f32 to vector<2x128xf32>
    %7 = arith.subf %6, %5 : vector<2x128xf32>
    %8 = math.exp %7 : vector<2x128xf32>
    %cst_6 = arith.constant 1.000000e+00 : f32
    %9 = vector.broadcast %cst_6 : f32 to vector<2x128xf32>
    %10 = arith.addf %9, %8 : vector<2x128xf32>
    %11 = tpu.reciprocal %10 {approx = true} : vector<2x128xf32> -> vector<2x128xf32>
    %c0_7 = arith.constant 0 : index
    %c0_8 = arith.constant 0 : index
    %12 = vector.load %arg3[%c0_7, %c0_8] : memref<2x128xf32, #tpu.memory_space<vmem>>, vector<2x128xf32>
    tpu.vector_store %arg3[%c0_7, %c0_8], %11 {strides = array<i32>} : memref<2x128xf32, #tpu.memory_space<vmem>>, vector<2x128xf32>,
    return
  }
}

</mosaic_0001>

<bundles_post_ra>
// kernel: discriminator_forward.5
= control target key start
LH: loop header
LB: loop body
LE: loop exit
PB: predicated region body
PF: predicated region fallthrough
CT: control target
= control target key end

     0   :  { %s1000_s18 = smov 0   ;;  %s1265_s0 = inlined_call_operand.vmem [shape: bf16[512,9], index: 0, kind: input, shape index: {}]   ;;  %s1266_s1 = inlined_call_operand.vmem [shape: bf16[9,16], index: 1, kind: input, shape index: {}]   ;;  %s1267_s2 = inlined_call_operand.vmem [shape: f32[1,16], index: 2, kind: input, shape index: {}]   ;;  %s1268_s3 = inlined_call_operand.vmem [shape: f32[1,16], index: 3, kind: input, shape index: {}]   ;;  %s1269_s4 = inlined_call_operand.vmem [shape: f32[1,16], index: 4, kind: input, shape index: {}]   ;;  %s1270_s5 = inlined_call_operand.vmem [shape: f32[512,16], index: 5, kind: output, shape index: {}]  }
   0x1 LB: > { %s835_s19 = sadd.s32 4294967295, %s967_s18   ;;  %p839_p0 = scmp.ge.s32.totalorder %s967_s18, 1  ;;  %s967_s18 = sphi %s1000_s18, %s15_s18  }
   0x2   : > { %p188_p1 = scmp.lt.s32.totalorder %s967_s18, 3 }
   0x4   : > { %p189_p2 = pnand %p839_p0, %p188_p1 }
   0x5   : > { %v944_v0 = vld [vmem:[%s1266_s1] sm:$0x1f] (!%p189_p2)   ;;  %vm404_vm0 = vcmask (!%p189_p2), 1043456   ;;  %vm405_vm1 = vcmask (!%p189_p2), 1044480   ;;  %s840_s22 = sshll.u32 (!%p189_p2), %s835_s19, 5  ;;  %v969_v1 = vmov (!%p189_p2), 65535  }
   0x6   : > { %192 = sbr.rel (%p189_p2) target bundleno = 286 (0x11e), region = 40  ;;  %v406_v2 = vsel (!%p189_p2), %vm404_vm0, 4294967295, %v969_v1  ;;  %p217_p3 = scmp.lt.s32.totalorder (!%p189_p2), %s840_s22, 63  ;;  %vm355_vm2 = vcmask (!%p189_p2), 72704   ;;  %v1054_v21 = vld [vmem:[%s1267_s2] ss:$0 sm:$0xff] (!%p189_p2) }
   0x7   : > { %v407_v3 = vsel (!%p189_p2), %vm405_vm1, %v406_v2, 0  ;;  %v1060_v26 = vld [vmem:[%s1268_s3] ss:$0 sm:$0xff] (!%p189_p2)  ;;  %vm746_vm3 = vcmask (!%p189_p2), 130048  }
   0x8   : > { %v409_v4 = vand.u32 (!%p189_p2), %v944_v0, %v407_v3  ;;  %v1068_v32 = vld [vmem:[%s1269_s4] ss:$0 sm:$0xff] (!%p189_p2) }
   0xa   : > { %899 = vmatprep.subr.bf16.mxu0 (!%p189_p2), %v409_v4  ;;  %933 = vmatprep.subr.bf16.mxu1 (!%p189_p2), %v409_v4 }
   0xb   : > { %900 = vmatpush3.bf16.msra.mxu0 (!%p189_p2), %v409_v4  ;;  %934 = vmatpush3.bf16.msra.mxu1 (!%p189_p2), %v409_v4 }
   0xd   : > { %s1272_s22 = smov (!%p217_p3, %s840_s22), 63 }
   0xe   : > { %s841_s23 = sshll.u32 %s1272_s22, 2  ;;  %s843_s6 = sshll.u32 %s1272_s22, 3 }
   0xf   : > { %s1017_s26 = scalar_lea.vmem %s1265_s0, %s841_s23  ;;  %s1076_s11 = scalar_lea.vmem %s1270_s5, %s843_s6 }
  0x10   : > { %v945_v5 = vld [vmem:[%s1017_s26] sm:$0xff]   ;;  %v947_v7 = vld [vmem:[%s1017_s26 + $0x8] sm:$0xff]   ;;  %v949_v9 = vld [vmem:[%s1017_s26 + $0x10] sm:$0xff]  }
  0x11   : > { %v946_v6 = vld [vmem:[%s1017_s26 + $0x40] sm:$0xff]   ;;  %901 = vmatprep.mubr.msk.bf16.mxu0 %vm355_vm2, %v945_v5  ;;  %v948_v8 = vld [vmem:[%s1017_s26 + $0x48] sm:$0xff]   ;;  %v950_v10 = vld [vmem:[%s1017_s26 + $0x50] sm:$0xff]  }
  0x12   : > { %917 = vmatprep.mubr.msk.bf16.mxu1 %vm355_vm2, %v946_v6  ;;  %902 = vmatmul.mubr.msk.bf16.vlgmr.msra.gmra.mrb[0].mxu0 %vm355_vm2, %v947_v7  ;;  %v951_v11 = vld [vmem:[%s1017_s26 + $0x18] sm:$0xff]   ;;  %v953_v13 = vld [vmem:[%s1017_s26 + $0x20] sm:$0xff]   ;;  %v955_v15 = vld [vmem:[%s1017_s26 + $0x28] sm:$0xff]  }
  0x13   : > { %918 = vmatmul.mubr.msk.bf16.vlgmr.msra.gmra.mrb[0].mxu1 %vm355_vm2, %v948_v8  ;;  %905 = vmatprep.mubr.msk.bf16.mxu0 %vm355_vm2, %v949_v9  ;;  %v952_v12 = vld [vmem:[%s1017_s26 + $0x58] sm:$0xff]   ;;  %v954_v14 = vld [vmem:[%s1017_s26 + $0x60] sm:$0xff]   ;;  %v956_v16 = vld [vmem:[%s1017_s26 + $0x68] sm:$0xff]  }
  0x14   : > { %921 = vmatprep.mubr.msk.bf16.mxu1 %vm355_vm2, %v950_v10  ;;  %v957_v17 = vld [vmem:[%s1017_s26 + $0x30] sm:$0xff]   ;;  %v959_v19 = vld [vmem:[%s1017_s26 + $0x38] sm:$0xff]  }
  0x15   : > { %v958_v18 = vld [vmem:[%s1017_s26 + $0x70] sm:$0xff]   ;;  %v960_v20 = vld [vmem:[%s1017_s26 + $0x78] sm:$0xff]  }
  0x1a   : > { %906 = vmatmul.mubr.msk.bf16.gmra.mrb[4].mxu0 %vm355_vm2, %v951_v11 }
  0x1b   : > { %922 = vmatmul.mubr.msk.bf16.gmra.mrb[4].mxu1 %vm355_vm2, %v952_v12  ;;  %909 = vmatprep.mubr.msk.bf16.mxu0 %vm355_vm2, %v953_v13 }
  0x1c   : > { %925 = vmatprep.mubr.msk.bf16.mxu1 %vm355_vm2, %v954_v14 }
  0x22   : > { %910 = vmatmul.mubr.msk.bf16.gmra.mrb[8].mxu0 %vm355_vm2, %v955_v15 }
  0x23   : > { %926 = vmatmul.mubr.msk.bf16.gmra.mrb[8].mxu1 %vm355_vm2, %v956_v16  ;;  %913 = vmatprep.mubr.msk.bf16.mxu0 %vm355_vm2, %v957_v17 }
  0x24   : > { %929 = vmatprep.mubr.msk.bf16.mxu1 %vm355_vm2, %v958_v18 }
  0x2a   : > { %914 = vmatmul.mubr.msk.bf16.gmra.mrb[12].mxu0 %vm355_vm2, %v959_v19 }
  0x2b   : > { %930 = vmatmul.mubr.msk.bf16.gmra.mrb[12].mxu1 %vm355_vm2, %v960_v20 }
  0xe5   : > { %v903_v22 = vpop.f32.mrb[0].mxu0 }
  0xe6   : > { %v454_v23 = vadd.f32 %v903_v22, %v1054_v21  ;;  %v919_v24 = vpop.f32.mrb[0].mxu1  ;;  %v445_v25 = vpop.f32.mrb[1].mxu0 }
  0xe7   : > { %v518_v27 = vadd.f32 %v919_v24, %v1054_v21  ;;  %v446_v28 = vadd.f32 %v1054_v21, %v445_v25  ;;  %v509_v29 = vpop.f32.mrb[1].mxu1  ;;  %v904_v30 = vpop.f32.mrb[2].mxu0 }
  0xe8   : > { %vm574_vm4 = vcmp.gt.f32.partialorder %v454_v23, 0.0  ;;  %v606_v31 = vmul.f32 0.2, %v454_v23  ;;  %v510_v33 = vadd.f32 %v1054_v21, %v509_v29  ;;  %v457_v34 = vadd.f32 %v904_v30, %v1054_v21  ;;  %v920_v35 = vpop.f32.mrb[2].mxu1  ;;  %v448_v36 = vpop.f32.mrb[3].mxu0 }
  0xe9   : > { %vm590_vm5 = vcmp.gt.f32.partialorder %v518_v27, 0.0  ;;  %v622_v37 = vmul.f32 0.2, %v518_v27  ;;  %vm572_vm6 = vcmp.gt.f32.partialorder %v446_v28, 0.0  ;;  %v604_v38 = vmul.f32 0.2, %v446_v28 }
  0xea   : > { %v638_v39 = vsel %vm574_vm4, %v454_v23, %v606_v31  ;;  %vm588_vm7 = vcmp.gt.f32.partialorder %v510_v33, 0.0  ;;  %v620_v40 = vmul.f32 0.2, %v510_v33  ;;  %vm575_vm8 = vcmp.gt.f32.partialorder %v457_v34, 0.0  ;;  %v512_v41 = vpop.f32.mrb[3].mxu1 }
  0xeb   : > { %v677_v42 = vmul.f32 %v1060_v26, %v638_v39  ;;  %v654_v43 = vsel %vm590_vm5, %v518_v27, %v622_v37  ;;  %v636_v44 = vsel %vm572_vm6, %v446_v28, %v604_v38  ;;  %v607_v45 = vmul.f32 0.2, %v457_v34 }
  0xec   : > { %v693_v46 = vmul.f32 %v1060_v26, %v654_v43  ;;  %v675_v47 = vmul.f32 %v1060_v26, %v636_v44  ;;  %v652_v48 = vsel %vm588_vm7, %v510_v33, %v620_v40  ;;  %v521_v49 = vadd.f32 %v920_v35, %v1054_v21 }
  0xed   : > { %v716_v50 = vadd.f32 %v1068_v32, %v677_v42  ;;  %v691_v51 = vmul.f32 %v1060_v26, %v652_v48  ;;  %v639_v52 = vsel %vm575_vm8, %v457_v34, %v607_v45  ;;  %v449_v53 = vadd.f32 %v1054_v21, %v448_v36  ;;  %v907_v54 = vpop.f32.mrb[4].mxu0 }
  0xee   : > { %v732_v55 = vadd.f32 %v1068_v32, %v693_v46  ;;  %v714_v56 = vadd.f32 %v1068_v32, %v675_v47  ;;  %v678_v57 = vmul.f32 %v1060_v26, %v639_v52  ;;  %vm591_vm9 = vcmp.gt.f32.partialorder %v521_v49, 0.0  ;;  %v923_v58 = vpop.f32.mrb[4].mxu1  ;;  %v461_v59 = vpop.f32.mrb[5].mxu0 }
  0xef   : > { %749 = vst.msk [vmem:[%s1076_s11 + $0x10] sm:$0xff] %vm746_vm3, %v716_v50  ;;  %v730_v60 = vadd.f32 %v1068_v32, %v691_v51  ;;  %v623_v61 = vmul.f32 0.2, %v521_v49  ;;  %vm573_vm10 = vcmp.gt.f32.partialorder %v449_v53, 0.0  ;;  %v605_v62 = vmul.f32 0.2, %v449_v53 }
  0xf0   : > { %v525_v63 = vpop.f32.mrb[5].mxu1  ;;  %765 = vst.msk [vmem:[%s1076_s11 + $0x90] sm:$0xff] %vm746_vm3, %v732_v55  ;;  %747 = vst.msk [vmem:[%s1076_s11] sm:$0xff] %vm746_vm3, %v714_v56  ;;  %v717_v0 = vadd.f32 %v1068_v32, %v678_v57  ;;  %v513_v1 = vadd.f32 %v1054_v21, %v512_v41  ;;  %v470_v2 = vadd.f32 %v907_v54, %v1054_v21  ;;  %v908_v4 = vpop.f32.mrb[6].mxu0 }
  0xf1   : > { %v534_v3 = vadd.f32 %v923_v58, %v1054_v21  ;;  %v924_v5 = vpop.f32.mrb[6].mxu1  ;;  %763 = vst.msk [vmem:[%s1076_s11 + $0x80] sm:$0xff] %vm746_vm3, %v730_v60  ;;  %v655_v6 = vsel %vm591_vm9, %v521_v49, %v623_v61  ;;  %v637_v7 = vsel %vm573_vm10, %v449_v53, %v605_v62  ;;  %v462_v8 = vadd.f32 %v1054_v21, %v461_v59  ;;  %v464_v10 = vpop.f32.mrb[7].mxu0 }
  0xf2   : > { %v526_v9 = vadd.f32 %v1054_v21, %v525_v63  ;;  %v528_v11 = vpop.f32.mrb[7].mxu1  ;;  %750 = vst.msk [vmem:[%s1076_s11 + $0x18] sm:$0xff] %vm746_vm3, %v717_v0  ;;  %v694_v12 = vmul.f32 %v1060_v26, %v655_v6  ;;  %v676_v13 = vmul.f32 %v1060_v26, %v637_v7  ;;  %vm589_vm11 = vcmp.gt.f32.partialorder %v513_v1, 0.0 }
  0xf3   : > { %v621_v14 = vmul.f32 0.2, %v513_v1  ;;  %vm578_vm12 = vcmp.gt.f32.partialorder %v470_v2, 0.0  ;;  %v610_v15 = vmul.f32 0.2, %v470_v2  ;;  %vm594_vm13 = vcmp.gt.f32.partialorder %v534_v3, 0.0 }
  0xf4   : > { %v626_v16 = vmul.f32 0.2, %v534_v3  ;;  %v733_v17 = vadd.f32 %v1068_v32, %v694_v12  ;;  %v715_v18 = vadd.f32 %v1068_v32, %v676_v13  ;;  %vm576_vm14 = vcmp.gt.f32.partialorder %v462_v8, 0.0 }
  0xf5   : > { %v653_v19 = vsel %vm589_vm11, %v513_v1, %v621_v14  ;;  %v642_v22 = vsel %vm578_vm12, %v470_v2, %v610_v15  ;;  %v608_v24 = vmul.f32 0.2, %v462_v8  ;;  %v911_v25 = vpop.f32.mrb[8].mxu0  ;;  %vm592_vm15 = vcmp.gt.f32.partialorder %v526_v9, 0.0 }
  0xf6   : > { %v692_v20 = vmul.f32 %v1060_v26, %v653_v19  ;;  %v658_v23 = vsel %vm594_vm13, %v534_v3, %v626_v16  ;;  %766 = vst.msk [vmem:[%s1076_s11 + $0x98] sm:$0xff] %vm746_vm3, %v733_v17  ;;  %748 = vst.msk [vmem:[%s1076_s11 + $0x8] sm:$0xff] %vm746_vm3, %v715_v18  ;;  %v681_v27 = vmul.f32 %v1060_v26, %v642_v22  ;;  %v624_v29 = vmul.f32 0.2, %v526_v9  ;;  %v927_v30 = vpop.f32.mrb[8].mxu1  ;;  %v477_v31 = vpop.f32.mrb[9].mxu0 }
  0xf7   : > { %v697_v28 = vmul.f32 %v1060_v26, %v658_v23  ;;  %v640_v34 = vsel %vm576_vm14, %v462_v8, %v608_v24  ;;  %v473_v35 = vadd.f32 %v908_v4, %v1054_v21  ;;  %v537_v36 = vadd.f32 %v924_v5, %v1054_v21  ;;  %v541_v37 = vpop.f32.mrb[9].mxu1  ;;  %v912_v38 = vpop.f32.mrb[10].mxu0 }
  0xf8   : > { %v731_v33 = vadd.f32 %v1068_v32, %v692_v20  ;;  %v720_v39 = vadd.f32 %v1068_v32, %v681_v27  ;;  %v679_v41 = vmul.f32 %v1060_v26, %v640_v34  ;;  %v656_v42 = vsel %vm592_vm15, %v526_v9, %v624_v29  ;;  %v1122_v43 = vpop.f32.mrb[10].mxu1  ;;  %v1124_v44 = vpop.f32.mrb[11].mxu0 }
  0xf9   : > { %v736_v40 = vadd.f32 %v1068_v32, %v697_v28  ;;  %v695_v45 = vmul.f32 %v1060_v26, %v656_v42  ;;  %vm579_vm0 = vcmp.gt.f32.partialorder %v473_v35, 0.0  ;;  %v611_v46 = vmul.f32 0.2, %v473_v35  ;;  %v1129_v47 = vpop.f32.mrb[11].mxu1 }
  0xfa   : > { %764 = vst.msk [vmem:[%s1076_s11 + $0x88] sm:$0xff] %vm746_vm3, %v731_v33  ;;  %vm595_vm1 = vcmp.gt.f32.partialorder %v537_v36, 0.0  ;;  %753 = vst.msk [vmem:[%s1076_s11 + $0x30] sm:$0xff] %vm746_vm3, %v720_v39  ;;  %v718_v48 = vadd.f32 %v1068_v32, %v679_v41  ;;  %v627_v49 = vmul.f32 0.2, %v537_v36  ;;  %v465_v50 = vadd.f32 %v1054_v21, %v464_v10 }
  0xfb   : > { %769 = vst.msk [vmem:[%s1076_s11 + $0xb0] sm:$0xff] %vm746_vm3, %v736_v40  ;;  %v529_v51 = vadd.f32 %v1054_v21, %v528_v11  ;;  %v734_v52 = vadd.f32 %v1068_v32, %v695_v45  ;;  %v643_v53 = vsel %vm579_vm0, %v473_v35, %v611_v46  ;;  %v486_v54 = vadd.f32 %v911_v25, %v1054_v21 }
  0xfc   : > { %v550_v55 = vadd.f32 %v927_v30, %v1054_v21  ;;  %751 = vst.msk [vmem:[%s1076_s11 + $0x20] sm:$0xff] %vm746_vm3, %v718_v48  ;;  %v682_v56 = vmul.f32 %v1060_v26, %v643_v53  ;;  %v659_v57 = vsel %vm595_vm1, %v537_v36, %v627_v49  ;;  %vm577_vm2 = vcmp.gt.f32.partialorder %v465_v50, 0.0 }
  0xfd   : > { %v609_v58 = vmul.f32 0.2, %v465_v50  ;;  %767 = vst.msk [vmem:[%s1076_s11 + $0xa0] sm:$0xff] %vm746_vm3, %v734_v52  ;;  %v698_v59 = vmul.f32 %v1060_v26, %v659_v57  ;;  %vm593_vm4 = vcmp.gt.f32.partialorder %v529_v51, 0.0  ;;  %v625_v60 = vmul.f32 0.2, %v529_v51 }
  0xfe   : > { %vm582_vm5 = vcmp.gt.f32.partialorder %v486_v54, 0.0  ;;  %v1147_v61 = vpop.f32.mrb[12].mxu0  ;;  %v721_v62 = vadd.f32 %v1068_v32, %v682_v56  ;;  %v614_v0 = vmul.f32 0.2, %v486_v54  ;;  %vm598_vm6 = vcmp.gt.f32.partialorder %v550_v55, 0.0  ;;  %v931_v1 = vpop.f32.mrb[12].mxu1 }
  0xff   : > { %v641_v63 = vsel %vm577_vm2, %v465_v50, %v609_v58  ;;  %v493_v2 = vpop.f32.mrb[13].mxu0  ;;  %v737_v3 = vadd.f32 %v1068_v32, %v698_v59  ;;  %v657_v5 = vsel %vm593_vm4, %v529_v51, %v625_v60  ;;  %v630_v6 = vmul.f32 0.2, %v550_v55  ;;  %v1152_v7 = vpop.f32.mrb[13].mxu1 }
 0x100   : > { %v680_v4 = vmul.f32 %v1060_v26, %v641_v63  ;;  %v1154_v8 = vpop.f32.mrb[14].mxu0  ;;  %754 = vst.msk [vmem:[%s1076_s11 + $0x38] sm:$0xff] %vm746_vm3, %v721_v62  ;;  %v696_v9 = vmul.f32 %v1060_v26, %v657_v5  ;;  %v646_v10 = vsel %vm582_vm5, %v486_v54, %v614_v0  ;;  %v478_v11 = vadd.f32 %v1054_v21, %v477_v31  ;;  %v1162_v13 = vpop.f32.mrb[14].mxu1 }
 0x101   : > { %v542_v12 = vadd.f32 %v1054_v21, %v541_v37  ;;  %v1164_v14 = vpop.f32.mrb[15].mxu0  ;;  %770 = vst.msk [vmem:[%s1076_s11 + $0xb8] sm:$0xff] %vm746_vm3, %v737_v3  ;;  %v685_v16 = vmul.f32 %v1060_v26, %v646_v10  ;;  %v662_v17 = vsel %vm598_vm6, %v550_v55, %v630_v6  ;;  %v489_v18 = vadd.f32 %v912_v38, %v1054_v21  ;;  %v1172_v19 = vpop.f32.mrb[15].mxu1 }
 0x102   : > { %v719_v15 = vadd.f32 %v1068_v32, %v680_v4  ;;  %v735_v20 = vadd.f32 %v1068_v32, %v696_v9  ;;  %v701_v22 = vmul.f32 %v1060_v26, %v662_v17  ;;  %vm580_vm7 = vcmp.gt.f32.partialorder %v478_v11, 0.0 }
 0x103   : > { %v612_v23 = vmul.f32 0.2, %v478_v11  ;;  %v724_v24 = vadd.f32 %v1068_v32, %v685_v16  ;;  %vm596_vm8 = vcmp.gt.f32.partialorder %v542_v12, 0.0  ;;  %v628_v25 = vmul.f32 0.2, %v542_v12 }
 0x104   : > { %752 = vst.msk [vmem:[%s1076_s11 + $0x28] sm:$0xff] %vm746_vm3, %v719_v15  ;;  %vm583_vm9 = vcmp.gt.f32.partialorder %v489_v18, 0.0  ;;  %768 = vst.msk [vmem:[%s1076_s11 + $0xa8] sm:$0xff] %vm746_vm3, %v735_v20  ;;  %v740_v27 = vadd.f32 %v1068_v32, %v701_v22  ;;  %v615_v29 = vmul.f32 0.2, %v489_v18  ;;  %v553_v30 = vadd.f32 %v1122_v43, %v1054_v21 }
 0x105   : > { %v644_v28 = vsel %vm580_vm7, %v478_v11, %v612_v23  ;;  %757 = vst.msk [vmem:[%s1076_s11 + $0x50] sm:$0xff] %vm746_vm3, %v724_v24  ;;  %v660_v33 = vsel %vm596_vm8, %v542_v12, %v628_v25  ;;  %v481_v34 = vadd.f32 %v1054_v21, %v1124_v44  ;;  %v545_v35 = vadd.f32 %v1054_v21, %v1129_v47 }
 0x106   : > { %v683_v31 = vmul.f32 %v1060_v26, %v644_v28  ;;  %773 = vst.msk [vmem:[%s1076_s11 + $0xd0] sm:$0xff] %vm746_vm3, %v740_v27  ;;  %v699_v36 = vmul.f32 %v1060_v26, %v660_v33  ;;  %v647_v37 = vsel %vm583_vm9, %v489_v18, %v615_v29  ;;  %vm599_vm10 = vcmp.gt.f32.partialorder %v553_v30, 0.0 }
 0x107   : > { %v631_v38 = vmul.f32 0.2, %v553_v30  ;;  %v686_v40 = vmul.f32 %v1060_v26, %v647_v37  ;;  %vm581_vm11 = vcmp.gt.f32.partialorder %v481_v34, 0.0  ;;  %v613_v41 = vmul.f32 0.2, %v481_v34 }
 0x108   : > { %v722_v39 = vadd.f32 %v1068_v32, %v683_v31  ;;  %v738_v42 = vadd.f32 %v1068_v32, %v699_v36  ;;  %vm597_vm12 = vcmp.gt.f32.partialorder %v545_v35, 0.0  ;;  %v629_v44 = vmul.f32 0.2, %v545_v35 }
 0x109   : > { %v663_v43 = vsel %vm599_vm10, %v553_v30, %v631_v38  ;;  %v725_v45 = vadd.f32 %v1068_v32, %v686_v40  ;;  %v645_v47 = vsel %vm581_vm11, %v481_v34, %v613_v41  ;;  %v502_v48 = vadd.f32 %v1147_v61, %v1054_v21 }
 0x10a   : > { %755 = vst.msk [vmem:[%s1076_s11 + $0x40] sm:$0xff] %vm746_vm3, %v722_v39  ;;  %v702_v46 = vmul.f32 %v1060_v26, %v663_v43  ;;  %771 = vst.msk [vmem:[%s1076_s11 + $0xc0] sm:$0xff] %vm746_vm3, %v738_v42  ;;  %v684_v49 = vmul.f32 %v1060_v26, %v645_v47  ;;  %v661_v50 = vsel %vm597_vm12, %v545_v35, %v629_v44 }
 0x10b   : > { %v566_v51 = vadd.f32 %v931_v1, %v1054_v21  ;;  %v494_v52 = vadd.f32 %v1054_v21, %v493_v2  ;;  %758 = vst.msk [vmem:[%s1076_s11 + $0x58] sm:$0xff] %vm746_vm3, %v725_v45  ;;  %v700_v54 = vmul.f32 %v1060_v26, %v661_v50  ;;  %vm586_vm13 = vcmp.gt.f32.partialorder %v502_v48, 0.0 }
 0x10c   : > { %v741_v53 = vadd.f32 %v1068_v32, %v702_v46  ;;  %v618_v55 = vmul.f32 0.2, %v502_v48  ;;  %v723_v56 = vadd.f32 %v1068_v32, %v684_v49  ;;  %v558_v61 = vadd.f32 %v1054_v21, %v1152_v7 }
 0x10d   : > { %vm602_vm14 = vcmp.gt.f32.partialorder %v566_v51, 0.0  ;;  %v634_v57 = vmul.f32 0.2, %v566_v51  ;;  %vm584_vm15 = vcmp.gt.f32.partialorder %v494_v52, 0.0  ;;  %v739_v58 = vadd.f32 %v1068_v32, %v700_v54 }
 0x10e   : > { %774 = vst.msk [vmem:[%s1076_s11 + $0xd8] sm:$0xff] %vm746_vm3, %v741_v53  ;;  %v650_v59 = vsel %vm586_vm13, %v502_v48, %v618_v55  ;;  %v616_v60 = vmul.f32 0.2, %v494_v52  ;;  %756 = vst.msk [vmem:[%s1076_s11 + $0x48] sm:$0xff] %vm746_vm3, %v723_v56  ;;  %v505_v0 = vadd.f32 %v1154_v8, %v1054_v21  ;;  %v569_v1 = vadd.f32 %v1162_v13, %v1054_v21 }
 0x10f   : > { %v689_v62 = vmul.f32 %v1060_v26, %v650_v59  ;;  %v666_v63 = vsel %vm602_vm14, %v566_v51, %v634_v57  ;;  %772 = vst.msk [vmem:[%s1076_s11 + $0xc8] sm:$0xff] %vm746_vm3, %v739_v58  ;;  %vm600_vm0 = vcmp.gt.f32.partialorder %v558_v61, 0.0  ;;  %v632_v4 = vmul.f32 0.2, %v558_v61 }
 0x110   : > { %v705_v2 = vmul.f32 %v1060_v26, %v666_v63  ;;  %v648_v3 = vsel %vm584_vm15, %v494_v52, %v616_v60  ;;  %vm587_vm1 = vcmp.gt.f32.partialorder %v505_v0, 0.0  ;;  %v619_v7 = vmul.f32 0.2, %v505_v0 }
 0x111   : > { %v728_v5 = vadd.f32 %v1068_v32, %v689_v62  ;;  %v687_v6 = vmul.f32 %v1060_v26, %v648_v3  ;;  %v664_v9 = vsel %vm600_vm0, %v558_v61, %v632_v4  ;;  %vm603_vm2 = vcmp.gt.f32.partialorder %v569_v1, 0.0 }
 0x112   : > { %v744_v8 = vadd.f32 %v1068_v32, %v705_v2  ;;  %v635_v10 = vmul.f32 0.2, %v569_v1  ;;  %v703_v12 = vmul.f32 %v1060_v26, %v664_v9  ;;  %v651_v13 = vsel %vm587_vm1, %v505_v0, %v619_v7 }
 0x113   : > { %761 = vst.msk [vmem:[%s1076_s11 + $0x70] sm:$0xff] %vm746_vm3, %v728_v5  ;;  %v726_v11 = vadd.f32 %v1068_v32, %v687_v6  ;;  %v497_v15 = vadd.f32 %v1054_v21, %v1164_v14  ;;  %v690_v16 = vmul.f32 %v1060_v26, %v651_v13  ;;  %v561_v18 = vadd.f32 %v1054_v21, %v1172_v19 }
 0x114   : > { %777 = vst.msk [vmem:[%s1076_s11 + $0xf0] sm:$0xff] %vm746_vm3, %v744_v8  ;;  %v667_v17 = vsel %vm603_vm2, %v569_v1, %v635_v10  ;;  %v742_v20 = vadd.f32 %v1068_v32, %v703_v12 }
 0x115   : > { %759 = vst.msk [vmem:[%s1076_s11 + $0x60] sm:$0xff] %vm746_vm3, %v726_v11  ;;  %v706_v22 = vmul.f32 %v1060_v26, %v667_v17  ;;  %vm585_vm4 = vcmp.gt.f32.partialorder %v497_v15, 0.0  ;;  %v617_v14 = vmul.f32 0.2, %v497_v15  ;;  %v729_v23 = vadd.f32 %v1068_v32, %v690_v16 }
 0x116   : > { %vm601_vm5 = vcmp.gt.f32.partialorder %v561_v18, 0.0  ;;  %v633_v24 = vmul.f32 0.2, %v561_v18  ;;  %775 = vst.msk [vmem:[%s1076_s11 + $0xe0] sm:$0xff] %vm746_vm3, %v742_v20 }
 0x117   : > { %v745_v25 = vadd.f32 %v1068_v32, %v706_v22  ;;  %v649_v27 = vsel %vm585_vm4, %v497_v15, %v617_v14  ;;  %762 = vst.msk [vmem:[%s1076_s11 + $0x78] sm:$0xff] %vm746_vm3, %v729_v23 }
 0x118   : > { %v688_v21 = vmul.f32 %v1060_v26, %v649_v27  ;;  %v665_v19 = vsel %vm601_vm5, %v561_v18, %v633_v24 }
 0x119   : > { %778 = vst.msk [vmem:[%s1076_s11 + $0xf8] sm:$0xff] %vm746_vm3, %v745_v25  ;;  %v704_v28 = vmul.f32 %v1060_v26, %v665_v19 }
 0x11a   : > { %v727_v29 = vadd.f32 %v1068_v32, %v688_v21 }
 0x11b   : > { %v743_v30 = vadd.f32 %v1068_v32, %v704_v28 }
 0x11c   : > { %760 = vst.msk [vmem:[%s1076_s11 + $0x68] sm:$0xff] %vm746_vm3, %v727_v29 }
 0x11d   : > { %776 = vst.msk [vmem:[%s1076_s11 + $0xe8] sm:$0xff] %vm746_vm3, %v743_v30 }
 0x11e PF: > { %s15_s18 = sadd.s32 1, %s967_s18  }
 0x11f   : > { %p12_p4 = scmp.ge.s32.totalorder %s15_s18, 4  }
 0x121   :  { %14 = sbr.rel (!%p12_p4) target bundleno = 1 (0x1), region = 70 }

// kernel: discriminator_forward.6
= control target key start
LH: loop header
LB: loop body
LE: loop exit
PB: predicated region body
PF: predicated region fallthrough
CT: control target
= control target key end

     0   :  { %v513_v0 = vmov 0   ;;  %vm188_vm0 = vcmask 130048   ;;  %vm404_vm4 = vcmask 261120   ;;  %s754_s1 = inlined_call_operand.vmem [shape: bf16[144,32], index: 1, kind: input, shape index: {}]   ;;  %s755_s0 = inlined_call_operand.vmem [shape: bf16[128,144], index: 0, kind: input, shape index: {}]   ;;  %s756_s2 = inlined_call_operand.vmem [shape: f32[1,32], index: 2, kind: input, shape index: {}]   ;;  %s757_s3 = inlined_call_operand.vmem [shape: f32[1,32], index: 3, kind: input, shape index: {}]   ;;  %s758_s4 = inlined_call_operand.vmem [shape: f32[1,32], index: 4, kind: input, shape index: {}]   ;;  %s759_s5 = inlined_call_operand.vmem [shape: f32[128,32], index: 5, kind: output, shape index: {}]  }
   0x1   :  { %213 = vmatprep.subr.bf16.mxu0 %v513_v0  ;;  %461 = vmatprep.subr.bf16.mxu1 %v513_v0  ;;  %v480_v1 = vld [vmem:[%s754_s1] sm:$0xff]   ;;  %v481_v2 = vld [vmem:[%s754_s1 + $0x8] sm:$0xff]   ;;  %v482_v3 = vld [vmem:[%s754_s1 + $0x10] sm:$0xff]  }
   0x2   :  { %214 = vmatpush1.bf16.msra.mxu0 %v480_v1  ;;  %470 = vmatpush1.bf16.msra.mxu1 %v480_v1  ;;  %v483_v4 = vld [vmem:[%s754_s1 + $0x18] sm:$0xff]   ;;  %v491_v5 = vld [vmem:[%s755_s0 + $0x4] ss:$8 sps:$4 sm:$0xff]   ;;  %v486_v9 = vld [vmem:[%s754_s1 + $0x30] sm:$0xff]  }
   0x3   :  { %215 = vmatprep.subr.bf16.mxu0 %v513_v0  ;;  %462 = vmatprep.subr.bf16.mxu1 %v513_v0  ;;  %v494_v6 = vld [vmem:[%s755_s0 + $0x44] ss:$8 sps:$4 sm:$0xff]   ;;  %v487_v10 = vld [vmem:[%s754_s1 + $0x38] sm:$0xff]   ;;  %v489_v12 = vld [vmem:[%s755_s0] ss:$8 sps:$4 sm:$0xff]  }
   0x4   :  { %451 = vmatprep.mubr.msk.bf16.mxu0 %vm188_vm0, %v491_v5  ;;  %455 = vmatprep.mubr.msk.bf16.mxu1 %vm188_vm0, %v494_v6  ;;  %v484_v7 = vld [vmem:[%s754_s1 + $0x20] sm:$0xff]   ;;  %v485_v8 = vld [vmem:[%s754_s1 + $0x28] sm:$0xff]   ;;  %v495_v14 = vld [vmem:[%s755_s0 + $0x14] ss:$8 sps:$4 sm:$0xff]  }
   0x5   :  { %v488_v11 = vld [vmem:[%s754_s1 + $0x40] sm:$0xff]   ;;  %v497_v15 = vld [vmem:[%s755_s0 + $0x54] ss:$8 sps:$4 sm:$0xff]   ;;  %v499_v16 = vld [vmem:[%s755_s0 + $0x10] ss:$8 sps:$4 sm:$0xff]  }
   0x6   :  { %216 = vmatpush1.bf16.msra.mxu0 %v481_v2  ;;  %471 = vmatpush1.bf16.msra.mxu1 %v481_v2  ;;  %v492_v13 = vld [vmem:[%s755_s0 + $0x40] ss:$8 sps:$4 sm:$0xff]   ;;  %v500_v17 = vld [vmem:[%s755_s0 + $0x50] ss:$8 sps:$4 sm:$0xff]   ;;  %v501_v18 = vld [vmem:[%s755_s0 + $0x24] ss:$8 sps:$4 sm:$0xff]  }
   0x7   :  { %217 = vmatprep.subr.bf16.mxu0 %v513_v0  ;;  %463 = vmatprep.subr.bf16.mxu1 %v513_v0  ;;  %v503_v19 = vld [vmem:[%s755_s0 + $0x64] ss:$8 sps:$4 sm:$0xff]   ;;  %v505_v20 = vld [vmem:[%s755_s0 + $0x20] ss:$8 sps:$4 sm:$0xff]   ;;  %v507_v22 = vld [vmem:[%s755_s0 + $0x34] ss:$8 sps:$4 sm:$0xff]  }
   0x8   :  { %v506_v21 = vld [vmem:[%s755_s0 + $0x60] ss:$8 sps:$4 sm:$0xff]   ;;  %v509_v23 = vld [vmem:[%s755_s0 + $0x74] ss:$8 sps:$4 sm:$0xff]   ;;  %v511_v24 = vld [vmem:[%s755_s0 + $0x30] ss:$8 sps:$4 sm:$0xff]  }
   0x9   :  { %v512_v25 = vld [vmem:[%s755_s0 + $0x70] ss:$8 sps:$4 sm:$0xff]   ;;  %v630_v26 = vld [vmem:[%s756_s2] ss:$0 sm:$0xff] }
   0xa   :  { %218 = vmatpush1.bf16.msra.mxu0 %v482_v3  ;;  %472 = vmatpush1.bf16.msra.mxu1 %v482_v3  ;;  %v637_v33 = vld [vmem:[%s757_s3] ss:$0 sm:$0xff] }
   0xb   :  { %219 = vmatprep.subr.bf16.mxu0 %v513_v0  ;;  %464 = vmatprep.subr.bf16.mxu1 %v513_v0  ;;  %v644_v43 = vld [vmem:[%s758_s4] ss:$0 sm:$0xff] }
   0xe   :  { %220 = vmatpush1.bf16.msra.mxu0 %v483_v4  ;;  %473 = vmatpush1.bf16.msra.mxu1 %v483_v4 }
   0xf   :  { %221 = vmatprep.subr.bf16.mxu0 %v513_v0  ;;  %465 = vmatprep.subr.bf16.mxu1 %v513_v0 }
  0x12   :  { %222 = vmatpush1.bf16.msra.mxu0 %v484_v7  ;;  %474 = vmatpush1.bf16.msra.mxu1 %v484_v7 }
  0x13   :  { %223 = vmatprep.subr.bf16.mxu0 %v513_v0  ;;  %466 = vmatprep.subr.bf16.mxu1 %v513_v0 }
  0x16   :  { %224 = vmatpush1.bf16.msra.mxu0 %v485_v8  ;;  %475 = vmatpush1.bf16.msra.mxu1 %v485_v8 }
  0x17   :  { %225 = vmatprep.subr.bf16.mxu0 %v513_v0  ;;  %467 = vmatprep.subr.bf16.mxu1 %v513_v0 }
  0x1a   :  { %226 = vmatpush1.bf16.msra.mxu0 %v486_v9  ;;  %476 = vmatpush1.bf16.msra.mxu1 %v486_v9 }
  0x1b   :  { %227 = vmatprep.subr.bf16.mxu0 %v513_v0  ;;  %468 = vmatprep.subr.bf16.mxu1 %v513_v0 }
  0x1e   :  { %228 = vmatpush1.bf16.msra.mxu0 %v487_v10  ;;  %477 = vmatpush1.bf16.msra.mxu1 %v487_v10 }
  0x1f   :  { %229 = vmatprep.subr.bf16.mxu0 %v513_v0  ;;  %469 = vmatprep.subr.bf16.mxu1 %v513_v0 }
  0x22   :  { %230 = vmatpush1.bf16.msra.mxu0 %v488_v11  ;;  %478 = vmatpush1.bf16.msra.mxu1 %v488_v11 }
  0x25   :  { %246 = vmatmul.mubr.bf16.vlgmr.msra.gmra.mrb[0].mxu0 %v489_v12  ;;  %278 = vmatmul.mubr.bf16.vlgmr.msra.gmra.mrb[0].mxu1 %v492_v13 }
  0x26   :  { %452 = vmatprep.mubr.msk.bf16.mxu0 %vm188_vm0, %v495_v14  ;;  %456 = vmatprep.mubr.msk.bf16.mxu1 %vm188_vm0, %v497_v15 }
  0x2d   :  { %254 = vmatmul.mubr.bf16.gmra.mrb[4].mxu0 %v499_v16  ;;  %286 = vmatmul.mubr.bf16.gmra.mrb[4].mxu1 %v500_v17 }
  0x2e   :  { %453 = vmatprep.mubr.msk.bf16.mxu0 %vm188_vm0, %v501_v18  ;;  %457 = vmatprep.mubr.msk.bf16.mxu1 %vm188_vm0, %v503_v19 }
  0x35   :  { %262 = vmatmul.mubr.bf16.gmra.mrb[8].mxu0 %v505_v20  ;;  %294 = vmatmul.mubr.bf16.gmra.mrb[8].mxu1 %v506_v21 }
  0x36   :  { %454 = vmatprep.mubr.msk.bf16.mxu0 %vm188_vm0, %v507_v22  ;;  %458 = vmatprep.mubr.msk.bf16.mxu1 %vm188_vm0, %v509_v23 }
  0x3d   :  { %270 = vmatmul.mubr.bf16.gmra.mrb[12].mxu0 %v511_v24  ;;  %302 = vmatmul.mubr.bf16.gmra.mrb[12].mxu1 %v512_v25 }
  0xf8   :  { %v247_v27 = vpop.f32.mrb[0].mxu0  ;;  %v279_v28 = vpop.f32.mrb[0].mxu1 }
  0xf9   :  { %v248_v29 = vadd.f32 %v630_v26, %v247_v27  ;;  %v280_v30 = vadd.f32 %v630_v26, %v279_v28  ;;  %v249_v31 = vpop.f32.mrb[1].mxu0  ;;  %v281_v32 = vpop.f32.mrb[1].mxu1 }
  0xfa   :  { %v250_v34 = vpop.f32.mrb[2].mxu0  ;;  %v282_v35 = vpop.f32.mrb[2].mxu1 }
  0xfb   :  { %vm310_vm1 = vcmp.gt.f32.partialorder %v248_v29, 0.0  ;;  %v326_v36 = vmul.f32 0.2, %v248_v29  ;;  %vm318_vm2 = vcmp.gt.f32.partialorder %v280_v30, 0.0  ;;  %v334_v37 = vmul.f32 0.2, %v280_v30 }
  0xfc   :  { %v251_v38 = vadd.f32 %v630_v26, %v250_v34  ;;  %v283_v39 = vadd.f32 %v630_v26, %v282_v35  ;;  %v252_v40 = vpop.f32.mrb[3].mxu0  ;;  %v284_v41 = vpop.f32.mrb[3].mxu1 }
  0xfd   :  { %v342_v42 = vsel %vm310_vm1, %v248_v29, %v326_v36  ;;  %v350_v44 = vsel %vm318_vm2, %v280_v30, %v334_v37 }
  0xfe   :  { %v365_v45 = vmul.f32 %v637_v33, %v342_v42  ;;  %v373_v46 = vmul.f32 %v637_v33, %v350_v44  ;;  %vm311_vm3 = vcmp.gt.f32.partialorder %v251_v38, 0.0  ;;  %v327_v47 = vmul.f32 0.2, %v251_v38 }
  0xff   :  { %vm319_vm5 = vcmp.gt.f32.partialorder %v283_v39, 0.0  ;;  %v335_v48 = vmul.f32 0.2, %v283_v39 }
 0x100   :  { %v388_v49 = vadd.f32 %v644_v43, %v365_v45  ;;  %v396_v50 = vadd.f32 %v644_v43, %v373_v46  ;;  %v343_v51 = vsel %vm311_vm3, %v251_v38, %v327_v47  ;;  %v255_v52 = vpop.f32.mrb[4].mxu0  ;;  %v287_v53 = vpop.f32.mrb[4].mxu1 }
 0x101   :  { %v366_v54 = vmul.f32 %v637_v33, %v343_v51  ;;  %v351_v55 = vsel %vm319_vm5, %v283_v39, %v335_v48  ;;  %v256_v56 = vadd.f32 %v630_v26, %v255_v52  ;;  %v288_v57 = vadd.f32 %v630_v26, %v287_v53  ;;  %v257_v58 = vpop.f32.mrb[5].mxu0  ;;  %v289_v59 = vpop.f32.mrb[5].mxu1 }
 0x102   :  { %405 = vst.msk [vmem:[%s759_s5] sm:$0xff] %vm404_vm4, %v388_v49  ;;  %413 = vst.msk [vmem:[%s759_s5 + $0x40] sm:$0xff] %vm404_vm4, %v396_v50  ;;  %v374_v60 = vmul.f32 %v637_v33, %v351_v55  ;;  %v258_v61 = vpop.f32.mrb[6].mxu0  ;;  %v290_v62 = vpop.f32.mrb[6].mxu1 }
 0x103   :  { %v389_v63 = vadd.f32 %v644_v43, %v366_v54  ;;  %vm312_vm6 = vcmp.gt.f32.partialorder %v256_v56, 0.0  ;;  %v328_v0 = vmul.f32 0.2, %v256_v56  ;;  %vm320_vm7 = vcmp.gt.f32.partialorder %v288_v57, 0.0  ;;  %v260_v1 = vpop.f32.mrb[7].mxu0  ;;  %v292_v2 = vpop.f32.mrb[7].mxu1 }
 0x104   :  { %v397_v3 = vadd.f32 %v644_v43, %v374_v60  ;;  %v336_v4 = vmul.f32 0.2, %v288_v57  ;;  %v259_v5 = vadd.f32 %v630_v26, %v258_v61  ;;  %v291_v6 = vadd.f32 %v630_v26, %v290_v62 }
 0x105   :  { %406 = vst.msk [vmem:[%s759_s5 + $0x8] sm:$0xff] %vm404_vm4, %v389_v63  ;;  %v344_v7 = vsel %vm312_vm6, %v256_v56, %v328_v0 }
 0x106   :  { %414 = vst.msk [vmem:[%s759_s5 + $0x48] sm:$0xff] %vm404_vm4, %v397_v3  ;;  %v367_v8 = vmul.f32 %v637_v33, %v344_v7  ;;  %v352_v9 = vsel %vm320_vm7, %v288_v57, %v336_v4  ;;  %vm313_vm8 = vcmp.gt.f32.partialorder %v259_v5, 0.0  ;;  %v329_v10 = vmul.f32 0.2, %v259_v5 }
 0x107   :  { %v375_v11 = vmul.f32 %v637_v33, %v352_v9  ;;  %vm321_vm9 = vcmp.gt.f32.partialorder %v291_v6, 0.0  ;;  %v337_v12 = vmul.f32 0.2, %v291_v6 }
 0x108   :  { %v390_v13 = vadd.f32 %v644_v43, %v367_v8  ;;  %v345_v14 = vsel %vm313_vm8, %v259_v5, %v329_v10  ;;  %v263_v15 = vpop.f32.mrb[8].mxu0  ;;  %v295_v16 = vpop.f32.mrb[8].mxu1 }
 0x109   :  { %v398_v17 = vadd.f32 %v644_v43, %v375_v11  ;;  %v368_v18 = vmul.f32 %v637_v33, %v345_v14  ;;  %v353_v19 = vsel %vm321_vm9, %v291_v6, %v337_v12  ;;  %v264_v20 = vadd.f32 %v630_v26, %v263_v15  ;;  %v265_v21 = vpop.f32.mrb[9].mxu0  ;;  %v297_v22 = vpop.f32.mrb[9].mxu1 }
 0x10a   :  { %407 = vst.msk [vmem:[%s759_s5 + $0x10] sm:$0xff] %vm404_vm4, %v390_v13  ;;  %v376_v23 = vmul.f32 %v637_v33, %v353_v19  ;;  %v296_v24 = vadd.f32 %v630_v26, %v295_v16  ;;  %v266_v25 = vpop.f32.mrb[10].mxu0  ;;  %v298_v27 = vpop.f32.mrb[10].mxu1 }
 0x10b   :  { %415 = vst.msk [vmem:[%s759_s5 + $0x50] sm:$0xff] %vm404_vm4, %v398_v17  ;;  %v391_v28 = vadd.f32 %v644_v43, %v368_v18  ;;  %vm314_vm10 = vcmp.gt.f32.partialorder %v264_v20, 0.0  ;;  %v330_v29 = vmul.f32 0.2, %v264_v20  ;;  %v267_v30 = vadd.f32 %v630_v26, %v266_v25  ;;  %v268_v31 = vpop.f32.mrb[11].mxu0  ;;  %v300_v32 = vpop.f32.mrb[11].mxu1 }
 0x10c   :  { %v399_v34 = vadd.f32 %v644_v43, %v376_v23  ;;  %vm322_vm11 = vcmp.gt.f32.partialorder %v296_v24, 0.0  ;;  %v338_v35 = vmul.f32 0.2, %v296_v24  ;;  %v299_v36 = vadd.f32 %v630_v26, %v298_v27 }
 0x10d   :  { %408 = vst.msk [vmem:[%s759_s5 + $0x18] sm:$0xff] %vm404_vm4, %v391_v28  ;;  %v346_v37 = vsel %vm314_vm10, %v264_v20, %v330_v29  ;;  %vm315_vm12 = vcmp.gt.f32.partialorder %v267_v30, 0.0  ;;  %v331_v38 = vmul.f32 0.2, %v267_v30 }
 0x10e   :  { %416 = vst.msk [vmem:[%s759_s5 + $0x58] sm:$0xff] %vm404_vm4, %v399_v34  ;;  %v369_v39 = vmul.f32 %v637_v33, %v346_v37  ;;  %v354_v40 = vsel %vm322_vm11, %v296_v24, %v338_v35  ;;  %vm323_vm13 = vcmp.gt.f32.partialorder %v299_v36, 0.0  ;;  %v339_v41 = vmul.f32 0.2, %v299_v36 }
 0x10f   :  { %v377_v42 = vmul.f32 %v637_v33, %v354_v40  ;;  %v347_v44 = vsel %vm315_vm12, %v267_v30, %v331_v38 }
 0x110   :  { %v392_v45 = vadd.f32 %v644_v43, %v369_v39  ;;  %v370_v46 = vmul.f32 %v637_v33, %v347_v44  ;;  %v355_v47 = vsel %vm323_vm13, %v299_v36, %v339_v41  ;;  %v271_v48 = vpop.f32.mrb[12].mxu0  ;;  %v303_v49 = vpop.f32.mrb[12].mxu1 }
 0x111   :  { %v400_v50 = vadd.f32 %v644_v43, %v377_v42  ;;  %v378_v51 = vmul.f32 %v637_v33, %v355_v47  ;;  %v272_v52 = vadd.f32 %v630_v26, %v271_v48  ;;  %v304_v53 = vadd.f32 %v630_v26, %v303_v49  ;;  %v273_v54 = vpop.f32.mrb[13].mxu0  ;;  %v305_v55 = vpop.f32.mrb[13].mxu1 }
 0x112   :  { %409 = vst.msk [vmem:[%s759_s5 + $0x20] sm:$0xff] %vm404_vm4, %v392_v45  ;;  %v393_v56 = vadd.f32 %v644_v43, %v370_v46  ;;  %v274_v57 = vpop.f32.mrb[14].mxu0  ;;  %v306_v58 = vpop.f32.mrb[14].mxu1 }
 0x113   :  { %417 = vst.msk [vmem:[%s759_s5 + $0x60] sm:$0xff] %vm404_vm4, %v400_v50  ;;  %v401_v59 = vadd.f32 %v644_v43, %v378_v51  ;;  %vm316_vm14 = vcmp.gt.f32.partialorder %v272_v52, 0.0  ;;  %v332_v60 = vmul.f32 0.2, %v272_v52  ;;  %vm324_vm15 = vcmp.gt.f32.partialorder %v304_v53, 0.0  ;;  %v276_v61 = vpop.f32.mrb[15].mxu0 }
 0x114   :  { %v308_v62 = vpop.f32.mrb[15].mxu1  ;;  %410 = vst.msk [vmem:[%s759_s5 + $0x28] sm:$0xff] %vm404_vm4, %v393_v56  ;;  %v340_v63 = vmul.f32 0.2, %v304_v53  ;;  %v275_v0 = vadd.f32 %v630_v26, %v274_v57  ;;  %v307_v1 = vadd.f32 %v630_v26, %v306_v58 }
 0x115   :  { %418 = vst.msk [vmem:[%s759_s5 + $0x68] sm:$0xff] %vm404_vm4, %v401_v59  ;;  %v348_v2 = vsel %vm316_vm14, %v272_v52, %v332_v60 }
 0x116   :  { %v371_v3 = vmul.f32 %v637_v33, %v348_v2  ;;  %v356_v4 = vsel %vm324_vm15, %v304_v53, %v340_v63  ;;  %vm317_vm0 = vcmp.gt.f32.partialorder %v275_v0, 0.0  ;;  %v333_v5 = vmul.f32 0.2, %v275_v0 }
 0x117   :  { %v379_v6 = vmul.f32 %v637_v33, %v356_v4  ;;  %vm325_vm1 = vcmp.gt.f32.partialorder %v307_v1, 0.0  ;;  %v341_v7 = vmul.f32 0.2, %v307_v1 }
 0x118   :  { %v394_v8 = vadd.f32 %v644_v43, %v371_v3  ;;  %v349_v9 = vsel %vm317_vm0, %v275_v0, %v333_v5 }
 0x119   :  { %v402_v26 = vadd.f32 %v644_v43, %v379_v6  ;;  %v372_v10 = vmul.f32 %v637_v33, %v349_v9  ;;  %v357_v11 = vsel %vm325_vm1, %v307_v1, %v341_v7 }
 0x11a   :  { %411 = vst.msk [vmem:[%s759_s5 + $0x30] sm:$0xff] %vm404_vm4, %v394_v8  ;;  %v380_v12 = vmul.f32 %v637_v33, %v357_v11 }
 0x11b   :  { %419 = vst.msk [vmem:[%s759_s5 + $0x70] sm:$0xff] %vm404_vm4, %v402_v26  ;;  %v395_v13 = vadd.f32 %v644_v43, %v372_v10 }
 0x11c   :  { %v403_v14 = vadd.f32 %v644_v43, %v380_v12 }
 0x11d   :  { %412 = vst.msk [vmem:[%s759_s5 + $0x38] sm:$0xff] %vm404_vm4, %v395_v13 }
 0x11e   :  { %420 = vst.msk [vmem:[%s759_s5 + $0x78] sm:$0xff] %vm404_vm4, %v403_v14 }

// kernel: discriminator_forward.7
= control target key start
LH: loop header
LB: loop body
LE: loop exit
PB: predicated region body
PF: predicated region fallthrough
CT: control target
= control target key end

     0   :  { %vm210_vm0 = vcmask 261120   ;;  %vm349_vm3 = vcmask 523264   ;;  %s580_s1 = inlined_call_operand.vmem [shape: bf16[288,64], index: 1, kind: input, shape index: {}]   ;;  %s581_s0 = inlined_call_operand.vmem [shape: bf16[32,288], index: 0, kind: input, shape index: {}]   ;;  %s582_s2 = inlined_call_operand.vmem [shape: f32[1,64], index: 2, kind: input, shape index: {}]   ;;  %s583_s3 = inlined_call_operand.vmem [shape: f32[1,64], index: 3, kind: input, shape index: {}]   ;;  %s584_s4 = inlined_call_operand.vmem [shape: f32[1,64], index: 4, kind: input, shape index: {}]   ;;  %s585_s5 = inlined_call_operand.vmem [shape: f32[32,64], index: 5, kind: output, shape index: {}]  }
   0x1   :  { %v427_v0 = vld [vmem:[%s580_s1 + $0x40] sm:$0xff]   ;;  %v429_v2 = vld [vmem:[%s580_s1 + $0x48] sm:$0xff]   ;;  %v431_v4 = vld [vmem:[%s580_s1 + $0x50] sm:$0xff]  }
   0x2   :  { %v428_v1 = vld [vmem:[%s580_s1] sm:$0xff]   ;;  %387 = vmatprep.subr.bf16.mxu0 %v427_v0  ;;  %v430_v3 = vld [vmem:[%s580_s1 + $0x8] sm:$0xff]   ;;  %v432_v5 = vld [vmem:[%s580_s1 + $0x10] sm:$0xff]  }
   0x3   :  { %388 = vmatpush3.bf16.msra.mxu0 %v428_v1  ;;  %v433_v6 = vld [vmem:[%s580_s1 + $0x58] sm:$0xff]   ;;  %v435_v8 = vld [vmem:[%s580_s1 + $0x60] sm:$0xff]   ;;  %v437_v11 = vld [vmem:[%s580_s1 + $0x68] sm:$0xff]  }
   0x4   :  { %389 = vmatprep.subr.bf16.mxu0 %v429_v2  ;;  %v434_v7 = vld [vmem:[%s580_s1 + $0x18] sm:$0xff]   ;;  %v436_v9 = vld [vmem:[%s580_s1 + $0x20] sm:$0xff]   ;;  %v438_v12 = vld [vmem:[%s580_s1 + $0x28] sm:$0xff]  }
   0x5   :  { %v442_v10 = vld [vmem:[%s580_s1 + $0x80] sm:$0xff]   ;;  %v439_v13 = vld [vmem:[%s580_s1 + $0x70] sm:$0xff]   ;;  %v447_v15 = vld [vmem:[%s580_s1 + $0x88] sm:$0xff]  }
   0x6   :  { %419 = vmatprep.subr.bf16.mxu1 %v442_v10  ;;  %v446_v14 = vld [vmem:[%s581_s0 + $0x4] ss:$12 sps:$4 sm:$0xff]   ;;  %v448_v16 = vld [vmem:[%s581_s0 + $0x8] ss:$12 sps:$4 sm:$0xff]   ;;  %v449_v17 = vld [vmem:[%s581_s0 + $0x20] ss:$12 sps:$4 sm:$0xff]  }
   0x7   :  { %390 = vmatpush3.bf16.msra.mxu0 %v430_v3  ;;  %420 = vmatpush3.bf16.msra.mxu1 %v442_v10  ;;  %v440_v18 = vld [vmem:[%s580_s1 + $0x30] sm:$0xff]   ;;  %v441_v19 = vld [vmem:[%s580_s1 + $0x78] sm:$0xff]   ;;  %v444_v21 = vld [vmem:[%s581_s0] ss:$12 sps:$4 sm:$0xff]  }
   0x8   :  { %391 = vmatprep.subr.bf16.mxu0 %v431_v4  ;;  %249 = vmatprep.mubr.bf16.mxu0 %v446_v14  ;;  %v443_v20 = vld [vmem:[%s580_s1 + $0x38] sm:$0xff]   ;;  %v358_v30 = vld [vmem:[%s582_s2] ss:$0 sm:$0xff] }
   0x9   :  { %421 = vmatprep.subr.bf16.mxu1 %v447_v15  ;;  %423 = vmatprep.mubr.msk.bf16.mxu1 %vm210_vm0, %v448_v16  ;;  %v450_v22 = vld [vmem:[%s581_s0 + $0x1c] ss:$12 sps:$4 sm:$0xff]   ;;  %v452_v23 = vld [vmem:[%s581_s0 + $0x18] ss:$12 sps:$4 sm:$0xff]   ;;  %v385_v39 = vld [vmem:[%s583_s3] ss:$0 sm:$0xff] }
   0xa   :  { %v386_v44 = vld [vmem:[%s584_s4] ss:$0 sm:$0xff] }
   0xb   :  { %392 = vmatpush3.bf16.msra.mxu0 %v432_v5  ;;  %422 = vmatpush3.bf16.msra.mxu1 %v447_v15 }
   0xc   :  { %393 = vmatprep.subr.bf16.mxu0 %v433_v6 }
   0xe   :  { %424 = vmatmul.mubr.msk.bf16.vlgmr.msra.gmra.mrb[0].mxu1 %vm210_vm0, %v449_v17 }
   0xf   :  { %394 = vmatpush3.bf16.msra.mxu0 %v434_v7 }
  0x10   :  { %395 = vmatprep.subr.bf16.mxu0 %v435_v8 }
  0x13   :  { %396 = vmatpush3.bf16.msra.mxu0 %v436_v9 }
  0x14   :  { %397 = vmatprep.subr.bf16.mxu0 %v437_v11 }
  0x17   :  { %398 = vmatpush3.bf16.msra.mxu0 %v438_v12 }
  0x18   :  { %399 = vmatprep.subr.bf16.mxu0 %v439_v13 }
  0x1b   :  { %400 = vmatpush3.bf16.msra.mxu0 %v440_v18 }
  0x1c   :  { %401 = vmatprep.subr.bf16.mxu0 %v441_v19 }
  0x1f   :  { %402 = vmatpush3.bf16.msra.mxu0 %v443_v20 }
  0x22   :  { %250 = vmatmul.mubr.bf16.vlgmr.msra.gmra.mrb[0].mxu0 %v444_v21 }
  0x23   :  { %257 = vmatprep.mubr.bf16.mxu0 %v450_v22 }
  0x2a   :  { %258 = vmatmul.mubr.bf16.gmra.mrb[4].mxu0 %v452_v23 }
  0xe1   :  { %v425_v24 = vpop.f32.mrb[0].mxu1 }
  0xe2   :  { %v300_v25 = vpop.f32.mrb[1].mxu1 }
  0xe3   :  { %v426_v26 = vpop.f32.mrb[2].mxu1 }
  0xe4   :  { %v303_v27 = vpop.f32.mrb[3].mxu1 }
  0xf5   :  { %v403_v28 = vpop.f32.mrb[0].mxu0 }
  0xf6   :  { %v404_v29 = vpop.f32.mrb[1].mxu0 }
  0xf7   :  { %v405_v31 = vadd.f32 %v404_v29, %v403_v28  ;;  %v406_v32 = vpop.f32.mrb[2].mxu0 }
  0xf8   :  { %v407_v33 = vpop.f32.mrb[3].mxu0 }
  0xf9   :  { %v408_v34 = vadd.f32 %v407_v33, %v406_v32  ;;  %v252_v35 = vadd.f32 %v405_v31, %v358_v30 }
  0xfb   :  { %v301_v36 = vadd.f32 %v300_v25, %v252_v35  ;;  %v255_v37 = vadd.f32 %v408_v34, %v358_v30 }
  0xfd   :  { %vm315_vm1 = vcmp.gt.f32.partialorder %v301_v36, 0.0  ;;  %v319_v38 = vmul.f32 0.2, %v301_v36  ;;  %v304_v40 = vadd.f32 %v303_v27, %v255_v37  ;;  %v409_v41 = vpop.f32.mrb[4].mxu0 }
  0xfe   :  { %v410_v42 = vpop.f32.mrb[5].mxu0 }
  0xff   :  { %v323_v43 = vsel %vm315_vm1, %v301_v36, %v319_v38  ;;  %vm316_vm2 = vcmp.gt.f32.partialorder %v304_v40, 0.0  ;;  %v320_v45 = vmul.f32 0.2, %v304_v40  ;;  %v411_v46 = vadd.f32 %v410_v42, %v409_v41  ;;  %v412_v47 = vpop.f32.mrb[6].mxu0 }
 0x100   :  { %v334_v48 = vmul.f32 %v385_v39, %v323_v43  ;;  %v413_v49 = vpop.f32.mrb[7].mxu0 }
 0x101   :  { %v324_v50 = vsel %vm316_vm2, %v304_v40, %v320_v45  ;;  %v260_v51 = vadd.f32 %v411_v46, %v358_v30  ;;  %v414_v52 = vadd.f32 %v413_v49, %v412_v47 }
 0x102   :  { %v345_v53 = vadd.f32 %v386_v44, %v334_v48  ;;  %v335_v54 = vmul.f32 %v385_v39, %v324_v50 }
 0x103   :  { %v309_v55 = vadd.f32 %v425_v24, %v260_v51  ;;  %v263_v56 = vadd.f32 %v414_v52, %v358_v30 }
 0x104   :  { %350 = vst.msk [vmem:[%s585_s5] sm:$0xff] %vm349_vm3, %v345_v53  ;;  %v346_v57 = vadd.f32 %v386_v44, %v335_v54 }
 0x105   :  { %vm317_vm4 = vcmp.gt.f32.partialorder %v309_v55, 0.0  ;;  %v321_v58 = vmul.f32 0.2, %v309_v55  ;;  %v312_v59 = vadd.f32 %v426_v26, %v263_v56 }
 0x106   :  { %351 = vst.msk [vmem:[%s585_s5 + $0x8] sm:$0xff] %vm349_vm3, %v346_v57 }
 0x107   :  { %v325_v60 = vsel %vm317_vm4, %v309_v55, %v321_v58  ;;  %vm318_vm5 = vcmp.gt.f32.partialorder %v312_v59, 0.0  ;;  %v322_v61 = vmul.f32 0.2, %v312_v59 }
 0x108   :  { %v336_v62 = vmul.f32 %v385_v39, %v325_v60 }
 0x109   :  { %v326_v63 = vsel %vm318_vm5, %v312_v59, %v322_v61 }
 0x10a   :  { %v347_v0 = vadd.f32 %v386_v44, %v336_v62  ;;  %v337_v1 = vmul.f32 %v385_v39, %v326_v63 }
 0x10c   :  { %352 = vst.msk [vmem:[%s585_s5 + $0x10] sm:$0xff] %vm349_vm3, %v347_v0  ;;  %v348_v2 = vadd.f32 %v386_v44, %v337_v1 }
 0x10e   :  { %353 = vst.msk [vmem:[%s585_s5 + $0x18] sm:$0xff] %vm349_vm3, %v348_v2 }

// kernel: discriminator_forward.8
= control target key start
LH: loop header
LB: loop body
LE: loop exit
PB: predicated region body
PF: predicated region fallthrough
CT: control target
= control target key end

     0   :  { %v633_v35 = vmov 0.0   ;;  %vm634_vm0 = vmmov 0   ;;  %vm336_vm1 = vcmask 523264   ;;  %s794_s1 = inlined_call_operand.vmem [shape: bf16[576,128], index: 1, kind: input, shape index: {}]   ;;  %s795_s0 = inlined_call_operand.vmem [shape: bf16[8,576], index: 0, kind: input, shape index: {}]   ;;  %s796_s2 = inlined_call_operand.vmem [shape: f32[1,128], index: 2, kind: input, shape index: {}]   ;;  %s797_s3 = inlined_call_operand.vmem [shape: f32[1,128], index: 3, kind: input, shape index: {}]   ;;  %s798_s4 = inlined_call_operand.vmem [shape: f32[1,128], index: 4, kind: input, shape index: {}]   ;;  %s799_s5 = inlined_call_operand.vmem [shape: f32[8,128], index: 5, kind: output, shape index: {}]  }
   0x1   :  { %v592_v0 = vld [vmem:[%s794_s1 + $0x40] sm:$0xff]   ;;  %v596_v4 = vld [vmem:[%s794_s1 + $0x48] sm:$0xff]   ;;  %v600_v8 = vld [vmem:[%s794_s1 + $0x50] sm:$0xff]  }
   0x2   :  { %v593_v1 = vld [vmem:[%s794_s1] sm:$0xff]   ;;  %529 = vmatprep.subr.bf16.mxu0 %v592_v0  ;;  %v597_v5 = vld [vmem:[%s794_s1 + $0x8] sm:$0xff]   ;;  %v601_v9 = vld [vmem:[%s794_s1 + $0x10] sm:$0xff]  }
   0x3   :  { %v594_v2 = vld [vmem:[%s794_s1 + $0xc0] sm:$0xff]   ;;  %530 = vmatpush3.bf16.msra.mxu0 %v593_v1  ;;  %v598_v6 = vld [vmem:[%s794_s1 + $0xc8] sm:$0xff]   ;;  %v602_v10 = vld [vmem:[%s794_s1 + $0xd0] sm:$0xff]  }
   0x4   :  { %v595_v3 = vld [vmem:[%s794_s1 + $0x80] sm:$0xff]   ;;  %551 = vmatprep.subr.bf16.mxu1 %v594_v2  ;;  %531 = vmatprep.subr.bf16.mxu0 %v596_v4  ;;  %v599_v7 = vld [vmem:[%s794_s1 + $0x88] sm:$0xff]   ;;  %v603_v11 = vld [vmem:[%s794_s1 + $0x90] sm:$0xff]  }
   0x5   :  { %552 = vmatpush3.bf16.msra.mxu1 %v595_v3  ;;  %v604_v12 = vld [vmem:[%s794_s1 + $0x58] sm:$0xff]   ;;  %v608_v16 = vld [vmem:[%s794_s1 + $0x60] sm:$0xff]   ;;  %v612_v20 = vld [vmem:[%s794_s1 + $0x68] sm:$0xff]  }
   0x6   :  { %553 = vmatprep.subr.bf16.mxu1 %v598_v6  ;;  %v605_v13 = vld [vmem:[%s794_s1 + $0x18] sm:$0xff]   ;;  %v609_v17 = vld [vmem:[%s794_s1 + $0x20] sm:$0xff]   ;;  %v613_v21 = vld [vmem:[%s794_s1 + $0x28] sm:$0xff]  }
   0x7   :  { %532 = vmatpush3.bf16.msra.mxu0 %v597_v5  ;;  %v606_v14 = vld [vmem:[%s794_s1 + $0xd8] sm:$0xff]   ;;  %v610_v18 = vld [vmem:[%s794_s1 + $0xe0] sm:$0xff]   ;;  %v614_v22 = vld [vmem:[%s794_s1 + $0xe8] sm:$0xff]  }
   0x8   :  { %533 = vmatprep.subr.bf16.mxu0 %v600_v8  ;;  %v607_v15 = vld [vmem:[%s794_s1 + $0x98] sm:$0xff]   ;;  %v611_v19 = vld [vmem:[%s794_s1 + $0xa0] sm:$0xff]   ;;  %v615_v23 = vld [vmem:[%s794_s1 + $0xa8] sm:$0xff]  }
   0x9   :  { %554 = vmatpush3.bf16.msra.mxu1 %v599_v7  ;;  %v616_v24 = vld [vmem:[%s794_s1 + $0x70] sm:$0xff]   ;;  %v620_v28 = vld [vmem:[%s794_s1 + $0x78] sm:$0xff]   ;;  %v21_v31 = vld [vmem:[%s795_s0] sm:$0xff] }
   0xa   :  { %555 = vmatprep.subr.bf16.mxu1 %v602_v10  ;;  %v617_v25 = vld [vmem:[%s794_s1 + $0x30] sm:$0xff]   ;;  %v621_v29 = vld [vmem:[%s794_s1 + $0x38] sm:$0xff]   ;;  %v485_v32 = vcombine.low %v21_v31, %v21_v31  ;;  %v486_v33 = vcombine.high %v21_v31, %v21_v31  ;;  %v22_v36 = vld [vmem:[%s795_s0 + $0x8] sm:$0xff] }
   0xb   :  { %534 = vmatpush3.bf16.msra.mxu0 %v601_v9  ;;  %v618_v26 = vld [vmem:[%s794_s1 + $0xf0] sm:$0xff]   ;;  %v622_v30 = vld [vmem:[%s794_s1 + $0xf8] sm:$0xff]   ;;  %v487_v37 = vcombine.low %v22_v36, %v22_v36  ;;  %v488_v38 = vcombine.high %v22_v36, %v22_v36  ;;  %v629_v39 = vld [vmem:[%s794_s1 + $0x100] sm:$0xff]  }
   0xc   :  { %535 = vmatprep.subr.bf16.mxu0 %v604_v12  ;;  %v619_v27 = vld [vmem:[%s794_s1 + $0xb0] sm:$0xff]   ;;  %v626_v34 = vld [vmem:[%s794_s1 + $0xb8] sm:$0xff]   ;;  %372 = vmatprep.mubr.bf16.mxu0 %v486_v33  ;;  %v630_v40 = vld [vmem:[%s794_s1 + $0x108] sm:$0xff]  }
   0xd   :  { %556 = vmatpush3.bf16.msra.mxu1 %v603_v11  ;;  %412 = vmatprep.mubr.bf16.mxu1 %v488_v38  ;;  %v631_v41 = vld [vmem:[%s794_s1 + $0x110] sm:$0xff]   ;;  %v632_v42 = vld [vmem:[%s794_s1 + $0x118] sm:$0xff]   ;;  %v484_v45 = vld [vmem:[%s796_s2] ss:$0 sm:$0xff] }
   0xe   :  { %557 = vmatprep.subr.bf16.mxu1 %v606_v14  ;;  %v625_v43 = vld [vmem:[%s795_s0 + $0x10] ss:$0 sps:$4 sm:$0xff]   ;;  %v527_v62 = vld [vmem:[%s797_s3] ss:$0 sm:$0xff] }
   0xf   :  { %536 = vmatpush3.bf16.msra.mxu0 %v605_v13  ;;  %v528_v1 = vld [vmem:[%s798_s4] ss:$0 sm:$0xff] }
  0x10   :  { %537 = vmatprep.subr.bf16.mxu0 %v608_v16 }
  0x11   :  { %558 = vmatpush3.bf16.msra.mxu1 %v607_v15 }
  0x12   :  { %559 = vmatprep.subr.bf16.mxu1 %v610_v18 }
  0x13   :  { %538 = vmatpush3.bf16.msra.mxu0 %v609_v17 }
  0x14   :  { %539 = vmatprep.subr.bf16.mxu0 %v612_v20 }
  0x15   :  { %560 = vmatpush3.bf16.msra.mxu1 %v611_v19 }
  0x16   :  { %561 = vmatprep.subr.bf16.mxu1 %v614_v22 }
  0x17   :  { %540 = vmatpush3.bf16.msra.mxu0 %v613_v21 }
  0x18   :  { %541 = vmatprep.subr.bf16.mxu0 %v616_v24 }
  0x19   :  { %562 = vmatpush3.bf16.msra.mxu1 %v615_v23 }
  0x1a   :  { %563 = vmatprep.subr.bf16.mxu1 %v618_v26 }
  0x1b   :  { %542 = vmatpush3.bf16.msra.mxu0 %v617_v25 }
  0x1c   :  { %543 = vmatprep.subr.bf16.mxu0 %v620_v28 }
  0x1d   :  { %564 = vmatpush3.bf16.msra.mxu1 %v619_v27 }
  0x1e   :  { %565 = vmatprep.subr.bf16.mxu1 %v622_v30 }
  0x1f   :  { %544 = vmatpush3.bf16.msra.mxu0 %v621_v29 }
  0x20   :  { %578 = vmatprep.subr.bf16.mxu0 %v633_v35 }
  0x21   :  { %566 = vmatpush3.bf16.msra.mxu1 %v626_v34 }
  0x22   :  { %373 = vmatmul.mubr.bf16.vlgmr.msra.gmra.mrb[0].mxu0 %v485_v32 }
  0x23   :  { %579 = vmatpush3.bf16.msra.mxu0 %v629_v39  ;;  %586 = vmatprep.mubr.msk.bf16.mxu0 %vm634_vm0, %v633_v35 }
  0x24   :  { %413 = vmatmul.mubr.bf16.vlgmr.msra.gmra.mrb[0].mxu1 %v487_v37  ;;  %580 = vmatprep.subr.bf16.mxu0 %v633_v35 }
  0x27   :  { %581 = vmatpush3.bf16.msra.mxu0 %v630_v40 }
  0x28   :  { %582 = vmatprep.subr.bf16.mxu0 %v633_v35 }
  0x2b   :  { %583 = vmatpush3.bf16.msra.mxu0 %v631_v41 }
  0x2c   :  { %584 = vmatprep.subr.bf16.mxu0 %v633_v35 }
  0x2f   :  { %585 = vmatpush3.bf16.msra.mxu0 %v632_v42 }
  0x32   :  { %587 = vmatmul.mubr.msk.bf16.vlgmr.msra.gmra.mrb[4].mxu0 %vm336_vm1, %v625_v43 }
  0xf5   :  { %v545_v44 = vpop.f32.mrb[0].mxu0 }
  0xf6   :  { %v546_v46 = vpop.f32.mrb[1].mxu0 }
  0xf7   :  { %v547_v47 = vadd.f32 %v546_v46, %v545_v44  ;;  %v548_v48 = vpop.f32.mrb[2].mxu0  ;;  %v567_v49 = vpop.f32.mrb[0].mxu1 }
  0xf8   :  { %v549_v50 = vpop.f32.mrb[3].mxu0  ;;  %v568_v51 = vpop.f32.mrb[1].mxu1 }
  0xf9   :  { %v375_v52 = vadd.f32 %v547_v47, %v484_v45  ;;  %v569_v53 = vadd.f32 %v568_v51, %v567_v49  ;;  %v570_v54 = vpop.f32.mrb[2].mxu1 }
  0xfa   :  { %v571_v55 = vpop.f32.mrb[3].mxu1 }
  0xfb   :  { %v415_v56 = vadd.f32 %v569_v53, %v375_v52 }
 0x105   :  { %v454_v57 = vpop.f32.mrb[4].mxu0 }
 0x106   :  { %v455_v58 = vadd.f32 %v454_v57, %v415_v56  ;;  %v588_v59 = vpop.f32.mrb[5].mxu0 }
 0x107   :  { %v457_v60 = vpop.f32.mrb[6].mxu0 }
 0x108   :  { %vm460_vm2 = vcmp.gt.f32.partialorder %v455_v58, 0.0  ;;  %v461_v61 = vmul.f32 0.2, %v455_v58  ;;  %v589_v63 = vpop.f32.mrb[7].mxu0 }
 0x10a   :  { %v462_v0 = vsel %vm460_vm2, %v455_v58, %v461_v61 }
 0x10b   :  { %v470_v2 = vmul.f32 %v527_v62, %v462_v0 }
 0x10d   :  { %v478_v3 = vadd.f32 %v528_v1, %v470_v2 }
 0x10f   :  { %479 = vst [vmem:[%s799_s5] sm:$0xff] %v478_v3 }

// kernel: discriminator_forward.9
= control target key start
LH: loop header
LB: loop body
LE: loop exit
PB: predicated region body
PF: predicated region fallthrough
CT: control target
= control target key end

     0   :  { %v513_v22 = vmov 1966171168   ;;  %v99_v24 = vlaneseq  ;;  %s639_s1 = inlined_call_operand.vmem [shape: bf16[512,128], index: 1, kind: input, shape index: {}]   ;;  %s640_s0 = inlined_call_operand.vmem [shape: bf16[2,512], index: 0, kind: input, shape index: {}]   ;;  %s641_s2 = inlined_call_operand.vmem [shape: f32[1,128], index: 2, kind: input, shape index: {}]   ;;  %s642_s3 = inlined_call_operand.vmem [shape: f32[2,128], index: 3, kind: output, shape index: {}]  }
   0x1   :  { %v477_v0 = vld [vmem:[%s639_s1 + $0x40] sm:$0xff]   ;;  %v481_v4 = vld [vmem:[%s639_s1 + $0x48] sm:$0xff]   ;;  %v485_v8 = vld [vmem:[%s639_s1 + $0x50] sm:$0xff]   ;;  %v97_v23 = vunpack.c.l.s4 %v513_v22 }
   0x2   :  { %v478_v1 = vld [vmem:[%s639_s1 + $0xc0] sm:$0xff]   ;;  %432 = vmatprep.subr.bf16.mxu0 %v477_v0  ;;  %v482_v5 = vld [vmem:[%s639_s1 + $0xc8] sm:$0xff]   ;;  %v486_v9 = vld [vmem:[%s639_s1 + $0xd0] sm:$0xff]   ;;  %v100_v30 = vshrl.u32 %v99_v24, 7 }
   0x3   :  { %v479_v2 = vld [vmem:[%s639_s1] sm:$0xff]   ;;  %454 = vmatprep.subr.bf16.mxu1 %v478_v1  ;;  %v483_v6 = vld [vmem:[%s639_s1 + $0x8] sm:$0xff]   ;;  %v487_v10 = vld [vmem:[%s639_s1 + $0x10] sm:$0xff]   ;;  %v98_v29 = vunpack.c.0.s8 %v97_v23 }
   0x4   :  { %v480_v3 = vld [vmem:[%s639_s1 + $0x80] sm:$0xff]   ;;  %433 = vmatpush3.bf16.msra.mxu0 %v479_v2  ;;  %v484_v7 = vld [vmem:[%s639_s1 + $0x88] sm:$0xff]   ;;  %v488_v11 = vld [vmem:[%s639_s1 + $0x90] sm:$0xff]  }
   0x5   :  { %455 = vmatpush3.bf16.msra.mxu1 %v480_v3  ;;  %434 = vmatprep.subr.bf16.mxu0 %v481_v4  ;;  %v489_v12 = vld [vmem:[%s639_s1 + $0x58] sm:$0xff]   ;;  %v493_v16 = vld [vmem:[%s639_s1 + $0x60] sm:$0xff]   ;;  %v497_v20 = vld [vmem:[%s639_s1 + $0x68] sm:$0xff]   ;;  %v101_v35 = vsub.s32 %v98_v29, %v100_v30 }
   0x6   :  { %456 = vmatprep.subr.bf16.mxu1 %v482_v5  ;;  %v490_v13 = vld [vmem:[%s639_s1 + $0xd8] sm:$0xff]   ;;  %v494_v17 = vld [vmem:[%s639_s1 + $0xe0] sm:$0xff]   ;;  %v498_v21 = vld [vmem:[%s639_s1 + $0xe8] sm:$0xff]  }
   0x7   :  { %v491_v14 = vld [vmem:[%s639_s1 + $0x18] sm:$0xff]   ;;  %v495_v18 = vld [vmem:[%s639_s1 + $0x20] sm:$0xff]   ;;  %v499_v25 = vld [vmem:[%s639_s1 + $0x28] sm:$0xff]  }
   0x8   :  { %435 = vmatpush3.bf16.msra.mxu0 %v483_v6  ;;  %v492_v15 = vld [vmem:[%s639_s1 + $0x98] sm:$0xff]   ;;  %v496_v19 = vld [vmem:[%s639_s1 + $0xa0] sm:$0xff]   ;;  %v500_v26 = vld [vmem:[%s639_s1 + $0xa8] sm:$0xff]  }
   0x9   :  { %457 = vmatpush3.bf16.msra.mxu1 %v484_v7  ;;  %436 = vmatprep.subr.bf16.mxu0 %v485_v8  ;;  %v501_v27 = vld [vmem:[%s639_s1 + $0x70] sm:$0xff]   ;;  %v505_v33 = vld [vmem:[%s639_s1 + $0x78] sm:$0xff]   ;;  %v399_v38 = vld.sshfl [vmem:[%s640_s0] sm:$0x33 pattern:$0x75316420] }
   0xa   :  { %458 = vmatprep.subr.bf16.mxu1 %v486_v9  ;;  %v502_v28 = vld [vmem:[%s639_s1 + $0xf0] sm:$0xff]   ;;  %v506_v34 = vld [vmem:[%s639_s1 + $0xf8] sm:$0xff]   ;;  %v95_v39 = vcombine.high %v399_v38, %v399_v38  ;;  %v102_v40 = vrot.slane %v399_v38, %v101_v35  ;;  %v398_v45 = vld [vmem:[%s641_s2] ss:$0 sm:$0xff] }
   0xb   :  { %v503_v31 = vld [vmem:[%s639_s1 + $0x30] sm:$0xff]   ;;  %v507_v36 = vld [vmem:[%s639_s1 + $0x38] sm:$0xff]  }
   0xc   :  { %437 = vmatpush3.bf16.msra.mxu0 %v487_v10  ;;  %v504_v32 = vld [vmem:[%s639_s1 + $0xb0] sm:$0xff]   ;;  %v508_v37 = vld [vmem:[%s639_s1 + $0xb8] sm:$0xff]   ;;  %v109_v41 = vrot.slane %v95_v39, %v101_v35  ;;  %v110_v42 = vcombine.high %v102_v40, %v102_v40 }
   0xd   :  { %459 = vmatpush3.bf16.msra.mxu1 %v488_v11  ;;  %438 = vmatprep.subr.bf16.mxu0 %v489_v12 }
   0xe   :  { %460 = vmatprep.subr.bf16.mxu1 %v490_v13  ;;  %340 = vmatprep.mubr.bf16.mxu0 %v109_v41  ;;  %v111_v43 = vcombine.high %v109_v41, %v109_v41 }
  0x10   :  { %439 = vmatpush3.bf16.msra.mxu0 %v491_v14  ;;  %380 = vmatprep.mubr.bf16.mxu1 %v111_v43 }
  0x11   :  { %461 = vmatpush3.bf16.msra.mxu1 %v492_v15  ;;  %440 = vmatprep.subr.bf16.mxu0 %v493_v16 }
  0x12   :  { %462 = vmatprep.subr.bf16.mxu1 %v494_v17 }
  0x14   :  { %441 = vmatpush3.bf16.msra.mxu0 %v495_v18 }
  0x15   :  { %463 = vmatpush3.bf16.msra.mxu1 %v496_v19  ;;  %442 = vmatprep.subr.bf16.mxu0 %v497_v20 }
  0x16   :  { %464 = vmatprep.subr.bf16.mxu1 %v498_v21 }
  0x18   :  { %443 = vmatpush3.bf16.msra.mxu0 %v499_v25 }
  0x19   :  { %465 = vmatpush3.bf16.msra.mxu1 %v500_v26  ;;  %444 = vmatprep.subr.bf16.mxu0 %v501_v27 }
  0x1a   :  { %466 = vmatprep.subr.bf16.mxu1 %v502_v28 }
  0x1c   :  { %445 = vmatpush3.bf16.msra.mxu0 %v503_v31 }
  0x1d   :  { %467 = vmatpush3.bf16.msra.mxu1 %v504_v32  ;;  %446 = vmatprep.subr.bf16.mxu0 %v505_v33 }
  0x1e   :  { %468 = vmatprep.subr.bf16.mxu1 %v506_v34 }
  0x20   :  { %447 = vmatpush3.bf16.msra.mxu0 %v507_v36 }
  0x21   :  { %469 = vmatpush3.bf16.msra.mxu1 %v508_v37 }
  0x23   :  { %341 = vmatmul.mubr.bf16.vlgmr.msra.gmra.mrb[0].mxu0 %v102_v40 }
  0x24   :  { %381 = vmatmul.mubr.bf16.vlgmr.msra.gmra.mrb[0].mxu1 %v110_v42 }
  0xf6   :  { %v448_v44 = vpop.f32.mrb[0].mxu0 }
  0xf7   :  { %v449_v46 = vpop.f32.mrb[1].mxu0  ;;  %v470_v47 = vpop.f32.mrb[0].mxu1 }
  0xf8   :  { %v450_v48 = vadd.f32 %v449_v46, %v448_v44  ;;  %v451_v49 = vpop.f32.mrb[2].mxu0  ;;  %v471_v50 = vpop.f32.mrb[1].mxu1 }
  0xf9   :  { %v452_v51 = vpop.f32.mrb[3].mxu0  ;;  %v472_v53 = vadd.f32 %v471_v50, %v470_v47  ;;  %v473_v54 = vpop.f32.mrb[2].mxu1 }
  0xfa   :  { %v343_v52 = vadd.f32 %v450_v48, %v398_v45  ;;  %v474_v55 = vpop.f32.mrb[3].mxu1 }
  0xfc   :  { %v383_v56 = vadd.f32 %v472_v53, %v343_v52 }
  0xfe   :  { %v388_v57 = vsub.f32 0.0, %v383_v56 }
 0x100   :  { %v389_v58 = vmul.f32 1.442695, %v388_v57 }
 0x102   :  { %509 = vpow2.f32 %v389_v58 }
 0x10c   :  { %v510_v59 = vpop.eup %509 }
 0x10d   :  { %v391_v60 = vadd.f32 1.0, %v510_v59 }
 0x10f   :  { %511 = vrcp.f32 %v391_v60 }
 0x119   :  { %v512_v61 = vpop.eup %511 }
 0x11a   :  { %393 = vst [vmem:[%s642_s3] sm:$0x3] %v512_v61 }

</bundles_post_ra>
